<compile_context>
chip_gen: v6e
topology: v6e:2x2x1
jax: 0.10.0
libtpu: 0.0.40
codegen_flags: <defaults>
</compile_context>

<pallas_src>
import functools

import numpy as np
import jax
import jax.numpy as jnp
from jax import lax
from jax.experimental import pallas as pl
from jax.experimental.pallas import tpu as pltpu

EPS = 1e-5
LEAKY_SLOPE = 0.01            # nn.LeakyReLU() default


# ---------------------------------------------------------------------------
# Fused kernel: kxk conv (k*k shifted dots) + folded BN + LeakyReLU + 1x1 res.
# ---------------------------------------------------------------------------
def _resblock_kernel(x_ref, w_ref, sh_ref, b1_ref, o_ref, *, k, wp, m_rows, cout):
    # x_ref : (Hp*Wp + k-1, cin)  one padded image, flattened row-major
    # w_ref : (k*k, cin, 2*cout)  tap-major weights; lanes [:cout] = BN-scaled
    #         kxk conv, lanes [cout:] = 1x1 residual conv (centre tap only)
    # o_ref : (m_rows, cout)      m_rows = Ho*Wp (cols >= Wo are junk, host drops)
    acc = jnp.zeros((m_rows, 2 * cout), jnp.float32)
    for di in range(k):
        for dj in range(k):
            shift = di * wp + dj                        # static Python int
            xs = x_ref[pl.ds(shift, m_rows), :]         # (m_rows, cin)
            acc = acc + jnp.dot(xs, w_ref[di * k + dj],
                                preferred_element_type=jnp.float32)
    y = acc[:, :cout] + sh_ref[...]                     # folded BN shift (+bias)
    y = jnp.where(y >= 0.0, y, LEAKY_SLOPE * y)         # LeakyReLU
    o_ref[...] = (y + acc[:, cout:] + b1_ref[...]).astype(o_ref.dtype)


# ---------------------------------------------------------------------------
# Residual_convBlock forward (NCHW in / NCHW out, matching PyTorch)
# ---------------------------------------------------------------------------
@functools.partial(jax.jit, static_argnames=("padding", "stride"))
def residual_conv_block(x_nchw, w3, b3, w1, b1,
                        gamma=None, beta=None, running_mean=None,
                        running_var=None, *, padding=1, stride=1):
    cout, cin, k, _ = w3.shape
    # residual add requires a spatial-preserving DB conv (stride=1, odd k,
    # padding=(k-1)//2), which also makes the centre tap exactly x.
    assert stride == 1 and k % 2 == 1 and padding == (k - 1) // 2, \
        "Residual_convBlock requires a spatial-preserving DB conv"

    N, _, H, W = x_nchw.shape
    Ho, Wo = H, W
    Hp, Wp = H + 2 * padding, W + 2 * padding
    m_rows = Ho * Wp                      # rows computed per image (cols >= Wo dropped)
    flat_len = Hp * Wp + (k - 1)          # extra rows keep the last tap slice in-bounds

    # eval-mode BatchNorm folding (defaults = fresh nn.BatchNorm2d)
    if gamma is None:        gamma = jnp.ones((cout,), jnp.float32)
    if beta is None:         beta = jnp.zeros((cout,), jnp.float32)
    if running_mean is None: running_mean = jnp.zeros((cout,), jnp.float32)
    if running_var is None:  running_var = jnp.ones((cout,), jnp.float32)
    bn_scale = gamma * lax.rsqrt(running_var.astype(jnp.float32) + EPS)   # (cout,)
    shift = beta + (b3 - running_mean) * bn_scale                          # (cout,)

    # weights: tap-major (k*k, cin, 2*cout); BN scale folded into the kxk taps,
    # the 1x1 residual conv packed into the spare lanes of the centre tap.
    w3m = jnp.transpose(w3, (2, 3, 1, 0)).reshape(k * k, cin, cout)
    w3m = (w3m * bn_scale).astype(jnp.float32)
    w1m = jnp.transpose(w1.reshape(cout, cin), (1, 0)).astype(jnp.float32)
    ctr = (k // 2) * k + (k // 2)
    res_lanes = jnp.zeros((k * k, cin, cout), jnp.float32).at[ctr].set(w1m)
    w_packed = jnp.concatenate([w3m, res_lanes], axis=-1)      # (k*k, cin, 2*cout)

    # NHWC, spatially padded, flattened — the only full pass over x on the host.
    x = jnp.transpose(x_nchw, (0, 2, 3, 1)).astype(jnp.float32)
    xp = jnp.pad(x, ((0, 0), (padding, padding), (padding, padding), (0, 0)))
    x_flat = jnp.pad(xp.reshape(N, Hp * Wp, cin), ((0, 0), (0, k - 1), (0, 0)))

    kern = functools.partial(_resblock_kernel, k=k, wp=Wp, m_rows=m_rows, cout=cout)
    out_flat = pl.pallas_call(
        kern,
        out_shape=jax.ShapeDtypeStruct((N * m_rows, cout), jnp.float32),
        grid_spec=pltpu.PrefetchScalarGridSpec(
            num_scalar_prefetch=0,
            grid=(N,),                                           # one image / step
            in_specs=[
                pl.BlockSpec((None, flat_len, cin), lambda b: (b, 0, 0)),
                pl.BlockSpec((k * k, cin, 2 * cout), lambda b: (0, 0, 0)),
                pl.BlockSpec((1, cout), lambda b: (0, 0)),
                pl.BlockSpec((1, cout), lambda b: (0, 0)),
            ],
            out_specs=pl.BlockSpec((m_rows, cout), lambda b: (b, 0)),
        ),
        compiler_params=pltpu.CompilerParams(
            dimension_semantics=("parallel",)),
    )(x_flat, w_packed,
      shift.reshape(1, cout).astype(jnp.float32),
      b1.reshape(1, cout).astype(jnp.float32))

    out = out_flat.reshape(N, Ho, Wp, cout)[:, :, :Wo, :]        # drop junk cols
    return jnp.transpose(out, (0, 3, 1, 2))                      # NCHW


# ---------------------------------------------------------------------------
# Plain-JAX reference (for correctness check)
# ---------------------------------------------------------------------------
def _reference(x_nchw, w3, b3, w1, b1, padding=1):
    dn = ("NHWC", "HWIO", "NHWC")
    x = jnp.transpose(x_nchw, (0, 2, 3, 1))
    w3h = jnp.transpose(w3, (2, 3, 1, 0))
    y = lax.conv_general_dilated(x, w3h, (1, 1),
                                 [(padding, padding), (padding, padding)],
                                 dimension_numbers=dn) + b3
    y = y * (1.0 / np.sqrt(1.0 + EPS))           # eval-mode BN defaults
    y = jnp.where(y >= 0.0, y, LEAKY_SLOPE * y)
    w1h = jnp.transpose(w1, (2, 3, 1, 0))
    x0 = lax.conv_general_dilated(x, w1h, (1, 1), [(0, 0), (0, 0)],
                                  dimension_numbers=dn) + b1
    return jnp.transpose(y + x0, (0, 3, 1, 2))


if __name__ == "__main__":
    # Shapes consistent with the module's use in CLPSTNet: the first encoder
    # block is Residual_convBlock(9, 16, 3) on a 16x16 image.
    B, Cin, Cout, H, W, K = 2, 9, 16, 16, 16, 3

    key = jax.random.PRNGKey(0)
    k0, k1, k2, k3, k4 = jax.random.split(key, 5)
    x = jax.random.normal(k0, (B, Cin, H, W), jnp.float32)
    bound3 = 1.0 / np.sqrt(Cin * K * K)
    w3 = jax.random.uniform(k1, (Cout, Cin, K, K), jnp.float32, -bound3, bound3)
    b3 = jax.random.uniform(k2, (Cout,), jnp.float32, -bound3, bound3)
    bound1 = 1.0 / np.sqrt(Cin)
    w1 = jax.random.uniform(k3, (Cout, Cin, 1, 1), jnp.float32, -bound1, bound1)
    b1 = jax.random.uniform(k4, (Cout,), jnp.float32, -bound1, bound1)

    out = residual_conv_block(x, w3, b3, w1, b1, padding=1, stride=1)
    jax.block_until_ready(out)
    assert out.shape == (B, Cout, H, W), out.shape
    assert bool(jnp.all(jnp.isfinite(out)))

    ref = _reference(x, w3, b3, w1, b1, padding=1)
    err = float(jnp.max(jnp.abs(out - ref)))
    scl = float(jnp.max(jnp.abs(ref))) + 1e-6
    assert err / scl < 1e-4, (err, scl)    # all-f32 path -> tight tolerance
    print("KERNEL_OK")
</pallas_src>

<mosaic_0001>
module attributes {stable_mosaic.version = 11 : i64} {
  func.func @_resblock_kernel(%arg0: i32, %arg1: memref<1x326x9xf32, #tpu.memory_space<vmem>>, %arg2: memref<9x9x32xf32, #tpu.memory_space<vmem>>, %arg3: memref<1x16xf32, #tpu.memory_space<vmem>>, %arg4: memref<1x16xf32, #tpu.memory_space<vmem>>, %arg5: memref<288x16xf32, #tpu.memory_space<vmem>>) attributes {dimension_semantics = [#tpu.dimension_semantics<parallel>], iteration_bounds = array<i64: 2>, scalar_prefetch = 0 : i64, scratch_operands = 0 : i64, tpu.core_type = #tpu.core_type<tc>, window_params = [{transform_indices = @transform_0, window_bounds = array<i64: 1, 326, 9>}, {pipeline_mode = #tpu.pipeline_mode<synchronous>, transform_indices = @transform_1, window_bounds = array<i64: 9, 9, 32>}, {pipeline_mode = #tpu.pipeline_mode<synchronous>, transform_indices = @transform_2, window_bounds = array<i64: 1, 16>}, {pipeline_mode = #tpu.pipeline_mode<synchronous>, transform_indices = @transform_3, window_bounds = array<i64: 1, 16>}, {transform_indices = @transform_4, window_bounds = array<i64: 288, 16>}]} {
    %cst = arith.constant 0.000000e+00 : f32
    %0 = vector.broadcast %cst : f32 to vector<288x32xf32>
    %c0 = arith.constant 0 : index
    %c0_0 = arith.constant 0 : index
    %c0_1 = arith.constant 0 : index
    %1 = vector.load %arg1[%c0, %c0_0, %c0_1] : memref<1x326x9xf32, #tpu.memory_space<vmem>>, vector<1x288x9xf32>
    %2 = vector.shape_cast %1 : vector<1x288x9xf32> to vector<288x9xf32>
    %c0_2 = arith.constant 0 : index
    %c0_3 = arith.constant 0 : index
    %c0_4 = arith.constant 0 : index
    %3 = vector.load %arg2[%c0_2, %c0_3, %c0_4] : memref<9x9x32xf32, #tpu.memory_space<vmem>>, vector<1x9x32xf32>
    %4 = vector.shape_cast %3 : vector<1x9x32xf32> to vector<9x32xf32>
    %cst_5 = arith.constant dense<0.000000e+00> : vector<288x32xf32>
    %5 = tpu.matmul %2, %4, %cst_5 {dimension_numbers = #tpu.dot_dimension_numbers<[1], [0], [0], [1], [0, 0, 1, 1], [], []>} : vector<288x9xf32>, vector<9x32xf32>, vector<288x32xf32> -> vector<288x32xf32>
    %6 = arith.addf %0, %5 : vector<288x32xf32>
    %c0_6 = arith.constant 0 : index
    %c1 = arith.constant 1 : index
    %c0_7 = arith.constant 0 : index
    %7 = vector.load %arg1[%c0_6, %c1, %c0_7] : memref<1x326x9xf32, #tpu.memory_space<vmem>>, vector<1x288x9xf32>
    %8 = vector.shape_cast %7 : vector<1x288x9xf32> to vector<288x9xf32>
    %c1_8 = arith.constant 1 : index
    %c0_9 = arith.constant 0 : index
    %c0_10 = arith.constant 0 : index
    %9 = vector.load %arg2[%c1_8, %c0_9, %c0_10] : memref<9x9x32xf32, #tpu.memory_space<vmem>>, vector<1x9x32xf32>
    %10 = vector.shape_cast %9 : vector<1x9x32xf32> to vector<9x32xf32>
    %cst_11 = arith.constant dense<0.000000e+00> : vector<288x32xf32>
    %11 = tpu.matmul %8, %10, %cst_11 {dimension_numbers = #tpu.dot_dimension_numbers<[1], [0], [0], [1], [0, 0, 1, 1], [], []>} : vector<288x9xf32>, vector<9x32xf32>, vector<288x32xf32> -> vector<288x32xf32>
    %12 = arith.addf %6, %11 : vector<288x32xf32>
    %c0_12 = arith.constant 0 : index
    %c2 = arith.constant 2 : index
    %c0_13 = arith.constant 0 : index
    %13 = vector.load %arg1[%c0_12, %c2, %c0_13] : memref<1x326x9xf32, #tpu.memory_space<vmem>>, vector<1x288x9xf32>
    %14 = vector.shape_cast %13 : vector<1x288x9xf32> to vector<288x9xf32>
    %c2_14 = arith.constant 2 : index
    %c0_15 = arith.constant 0 : index
    %c0_16 = arith.constant 0 : index
    %15 = vector.load %arg2[%c2_14, %c0_15, %c0_16] : memref<9x9x32xf32, #tpu.memory_space<vmem>>, vector<1x9x32xf32>
    %16 = vector.shape_cast %15 : vector<1x9x32xf32> to vector<9x32xf32>
    %cst_17 = arith.constant dense<0.000000e+00> : vector<288x32xf32>
    %17 = tpu.matmul %14, %16, %cst_17 {dimension_numbers = #tpu.dot_dimension_numbers<[1], [0], [0], [1], [0, 0, 1, 1], [], []>} : vector<288x9xf32>, vector<9x32xf32>, vector<288x32xf32> -> vector<288x32xf32>
    %18 = arith.addf %12, %17 : vector<288x32xf32>
    %c0_18 = arith.constant 0 : index
    %c18 = arith.constant 18 : index
    %c0_19 = arith.constant 0 : index
    %19 = vector.load %arg1[%c0_18, %c18, %c0_19] : memref<1x326x9xf32, #tpu.memory_space<vmem>>, vector<1x288x9xf32>
    %20 = vector.shape_cast %19 : vector<1x288x9xf32> to vector<288x9xf32>
    %c3 = arith.constant 3 : index
    %c0_20 = arith.constant 0 : index
    %c0_21 = arith.constant 0 : index
    %21 = vector.load %arg2[%c3, %c0_20, %c0_21] : memref<9x9x32xf32, #tpu.memory_space<vmem>>, vector<1x9x32xf32>
    %22 = vector.shape_cast %21 : vector<1x9x32xf32> to vector<9x32xf32>
    %cst_22 = arith.constant dense<0.000000e+00> : vector<288x32xf32>
    %23 = tpu.matmul %20, %22, %cst_22 {dimension_numbers = #tpu.dot_dimension_numbers<[1], [0], [0], [1], [0, 0, 1, 1], [], []>} : vector<288x9xf32>, vector<9x32xf32>, vector<288x32xf32> -> vector<288x32xf32>
    %24 = arith.addf %18, %23 : vector<288x32xf32>
    %c0_23 = arith.constant 0 : index
    %c19 = arith.constant 19 : index
    %c0_24 = arith.constant 0 : index
    %25 = vector.load %arg1[%c0_23, %c19, %c0_24] : memref<1x326x9xf32, #tpu.memory_space<vmem>>, vector<1x288x9xf32>
    %26 = vector.shape_cast %25 : vector<1x288x9xf32> to vector<288x9xf32>
    %c4 = arith.constant 4 : index
    %c0_25 = arith.constant 0 : index
    %c0_26 = arith.constant 0 : index
    %27 = vector.load %arg2[%c4, %c0_25, %c0_26] : memref<9x9x32xf32, #tpu.memory_space<vmem>>, vector<1x9x32xf32>
    %28 = vector.shape_cast %27 : vector<1x9x32xf32> to vector<9x32xf32>
    %cst_27 = arith.constant dense<0.000000e+00> : vector<288x32xf32>
    %29 = tpu.matmul %26, %28, %cst_27 {dimension_numbers = #tpu.dot_dimension_numbers<[1], [0], [0], [1], [0, 0, 1, 1], [], []>} : vector<288x9xf32>, vector<9x32xf32>, vector<288x32xf32> -> vector<288x32xf32>
    %30 = arith.addf %24, %29 : vector<288x32xf32>
    %c0_28 = arith.constant 0 : index
    %c20 = arith.constant 20 : index
    %c0_29 = arith.constant 0 : index
    %31 = vector.load %arg1[%c0_28, %c20, %c0_29] : memref<1x326x9xf32, #tpu.memory_space<vmem>>, vector<1x288x9xf32>
    %32 = vector.shape_cast %31 : vector<1x288x9xf32> to vector<288x9xf32>
    %c5 = arith.constant 5 : index
    %c0_30 = arith.constant 0 : index
    %c0_31 = arith.constant 0 : index
    %33 = vector.load %arg2[%c5, %c0_30, %c0_31] : memref<9x9x32xf32, #tpu.memory_space<vmem>>, vector<1x9x32xf32>
    %34 = vector.shape_cast %33 : vector<1x9x32xf32> to vector<9x32xf32>
    %cst_32 = arith.constant dense<0.000000e+00> : vector<288x32xf32>
    %35 = tpu.matmul %32, %34, %cst_32 {dimension_numbers = #tpu.dot_dimension_numbers<[1], [0], [0], [1], [0, 0, 1, 1], [], []>} : vector<288x9xf32>, vector<9x32xf32>, vector<288x32xf32> -> vector<288x32xf32>
    %36 = arith.addf %30, %35 : vector<288x32xf32>
    %c0_33 = arith.constant 0 : index
    %c36 = arith.constant 36 : index
    %c0_34 = arith.constant 0 : index
    %37 = vector.load %arg1[%c0_33, %c36, %c0_34] : memref<1x326x9xf32, #tpu.memory_space<vmem>>, vector<1x288x9xf32>
    %38 = vector.shape_cast %37 : vector<1x288x9xf32> to vector<288x9xf32>
    %c6 = arith.constant 6 : index
    %c0_35 = arith.constant 0 : index
    %c0_36 = arith.constant 0 : index
    %39 = vector.load %arg2[%c6, %c0_35, %c0_36] : memref<9x9x32xf32, #tpu.memory_space<vmem>>, vector<1x9x32xf32>
    %40 = vector.shape_cast %39 : vector<1x9x32xf32> to vector<9x32xf32>
    %cst_37 = arith.constant dense<0.000000e+00> : vector<288x32xf32>
    %41 = tpu.matmul %38, %40, %cst_37 {dimension_numbers = #tpu.dot_dimension_numbers<[1], [0], [0], [1], [0, 0, 1, 1], [], []>} : vector<288x9xf32>, vector<9x32xf32>, vector<288x32xf32> -> vector<288x32xf32>
    %42 = arith.addf %36, %41 : vector<288x32xf32>
    %c0_38 = arith.constant 0 : index
    %c37 = arith.constant 37 : index
    %c0_39 = arith.constant 0 : index
    %43 = vector.load %arg1[%c0_38, %c37, %c0_39] : memref<1x326x9xf32, #tpu.memory_space<vmem>>, vector<1x288x9xf32>
    %44 = vector.shape_cast %43 : vector<1x288x9xf32> to vector<288x9xf32>
    %c7 = arith.constant 7 : index
    %c0_40 = arith.constant 0 : index
    %c0_41 = arith.constant 0 : index
    %45 = vector.load %arg2[%c7, %c0_40, %c0_41] : memref<9x9x32xf32, #tpu.memory_space<vmem>>, vector<1x9x32xf32>
    %46 = vector.shape_cast %45 : vector<1x9x32xf32> to vector<9x32xf32>
    %cst_42 = arith.constant dense<0.000000e+00> : vector<288x32xf32>
    %47 = tpu.matmul %44, %46, %cst_42 {dimension_numbers = #tpu.dot_dimension_numbers<[1], [0], [0], [1], [0, 0, 1, 1], [], []>} : vector<288x9xf32>, vector<9x32xf32>, vector<288x32xf32> -> vector<288x32xf32>
    %48 = arith.addf %42, %47 : vector<288x32xf32>
    %c0_43 = arith.constant 0 : index
    %c38 = arith.constant 38 : index
    %c0_44 = arith.constant 0 : index
    %49 = vector.load %arg1[%c0_43, %c38, %c0_44] : memref<1x326x9xf32, #tpu.memory_space<vmem>>, vector<1x288x9xf32>
    %50 = vector.shape_cast %49 : vector<1x288x9xf32> to vector<288x9xf32>
    %c8 = arith.constant 8 : index
    %c0_45 = arith.constant 0 : index
    %c0_46 = arith.constant 0 : index
    %51 = vector.load %arg2[%c8, %c0_45, %c0_46] : memref<9x9x32xf32, #tpu.memory_space<vmem>>, vector<1x9x32xf32>
    %52 = vector.shape_cast %51 : vector<1x9x32xf32> to vector<9x32xf32>
    %cst_47 = arith.constant dense<0.000000e+00> : vector<288x32xf32>
    %53 = tpu.matmul %50, %52, %cst_47 {dimension_numbers = #tpu.dot_dimension_numbers<[1], [0], [0], [1], [0, 0, 1, 1], [], []>} : vector<288x9xf32>, vector<9x32xf32>, vector<288x32xf32> -> vector<288x32xf32>
    %54 = arith.addf %48, %53 : vector<288x32xf32>
    %55 = vector.extract_strided_slice %54 {offsets = [0, 0], sizes = [288, 16], strides = [1, 1]} : vector<288x32xf32> to vector<288x16xf32>
    %c0_48 = arith.constant 0 : index
    %c0_49 = arith.constant 0 : index
    %56 = vector.load %arg3[%c0_48, %c0_49] : memref<1x16xf32, #tpu.memory_space<vmem>>, vector<1x16xf32>
    %57 = vector.broadcast %56 : vector<1x16xf32> to vector<288x16xf32>
    %58 = arith.addf %55, %57 : vector<288x16xf32>
    %cst_50 = arith.constant 0.000000e+00 : f32
    %59 = vector.broadcast %cst_50 : f32 to vector<288x16xf32>
    %60 = arith.cmpf oge, %58, %59 : vector<288x16xf32>
    %cst_51 = arith.constant 0.00999999977 : f32
    %61 = vector.broadcast %cst_51 : f32 to vector<288x16xf32>
    %62 = arith.mulf %61, %58 : vector<288x16xf32>
    %63 = arith.select %60, %58, %62 : vector<288x16xi1>, vector<288x16xf32>
    %64 = vector.extract_strided_slice %54 {offsets = [0, 16], sizes = [288, 16], strides = [1, 1]} : vector<288x32xf32> to vector<288x16xf32>
    %65 = arith.addf %63, %64 : vector<288x16xf32>
    %c0_52 = arith.constant 0 : index
    %c0_53 = arith.constant 0 : index
    %66 = vector.load %arg4[%c0_52, %c0_53] : memref<1x16xf32, #tpu.memory_space<vmem>>, vector<1x16xf32>
    %67 = vector.broadcast %66 : vector<1x16xf32> to vector<288x16xf32>
    %68 = arith.addf %65, %67 : vector<288x16xf32>
    %c0_54 = arith.constant 0 : index
    %c0_55 = arith.constant 0 : index
    %69 = vector.load %arg5[%c0_54, %c0_55] : memref<288x16xf32, #tpu.memory_space<vmem>>, vector<288x16xf32>
    tpu.vector_store %arg5[%c0_54, %c0_55], %68 {strides = array<i32>} : memref<288x16xf32, #tpu.memory_space<vmem>>, vector<288x16xf32>,
    return
  }
  func.func @transform_0(%arg0: i32) -> (i32, i32, i32) {
    %c0_i32 = arith.constant 0 : i32
    %c0_i32_0 = arith.constant 0 : i32
    %c0_i32_1 = arith.constant 0 : i32
    return %arg0, %c0_i32, %c0_i32_0 : i32, i32, i32
  }
  func.func @transform_1(%arg0: i32) -> (i32, i32, i32) {
    %c0_i32 = arith.constant 0 : i32
    %c0_i32_0 = arith.constant 0 : i32
    %c0_i32_1 = arith.constant 0 : i32
    %c0_i32_2 = arith.constant 0 : i32
    return %c0_i32, %c0_i32_0, %c0_i32_1 : i32, i32, i32
  }
  func.func @transform_2(%arg0: i32) -> (i32, i32) {
    %c0_i32 = arith.constant 0 : i32
    %c0_i32_0 = arith.constant 0 : i32
    %c0_i32_1 = arith.constant 0 : i32
    return %c0_i32, %c0_i32_0 : i32, i32
  }
  func.func @transform_3(%arg0: i32) -> (i32, i32) {
    %c0_i32 = arith.constant 0 : i32
    %c0_i32_0 = arith.constant 0 : i32
    %c0_i32_1 = arith.constant 0 : i32
    return %c0_i32, %c0_i32_0 : i32, i32
  }
  func.func @transform_4(%arg0: i32) -> (i32, i32) {
    %c0_i32 = arith.constant 0 : i32
    %c0_i32_0 = arith.constant 0 : i32
    return %arg0, %c0_i32 : i32, i32
  }
}

</mosaic_0001>

<bundles_post_ra>
// kernel: residual_conv_block.1
= control target key start
LH: loop header
LB: loop body
LE: loop exit
PB: predicated region body
PF: predicated region fallthrough
CT: control target
= control target key end

     0   :  { %s5746_s15 = smov 0   ;;  %s7352_s0 = inlined_call_operand.vmem [shape: f32[2,326,9], index: 0, kind: input, shape index: {}]   ;;  %s7353_s1 = inlined_call_operand.vmem [shape: f32[9,9,32], index: 1, kind: input, shape index: {}]   ;;  %s7354_s2 = inlined_call_operand.vmem [shape: f32[1,16], index: 2, kind: input, shape index: {}]   ;;  %s7355_s3 = inlined_call_operand.vmem [shape: f32[1,16], index: 3, kind: input, shape index: {}]   ;;  %s7356_s4 = inlined_call_operand.vmem [shape: f32[576,16], index: 4, kind: output, shape index: {}]  }
   0x1 LB: > { %s5752_s16 = sadd.s32 4294967295, %s5718_s15   ;;  %p4478_p0 = scmp.ge.s32.totalorder %s5718_s15, 1  ;;  %s5718_s15 = sphi %s5746_s15, %s14_s15  }
   0x2   : > { %p162_p1 = scmp.lt.s32.totalorder %s5718_s15, 3 }
   0x4   : > { %p163_p2 = pnand %p4478_p0, %p162_p1 }
   0x5   : > { %p188_p3 = scmp.lt.s32.totalorder (!%p163_p2), %s5752_s16, 1  ;;  %s193_s9 = smul.u32 (!%p163_p2), 36, %s5752_s16 }
   0x6   : > { %166 = sbr.rel (%p163_p2) target bundleno = 659 (0x293), region = 36 }
   0x7   : > { %p194_p4 = scmp.lt.s32.totalorder (!%p163_p2), %s193_s9, 71 }
   0xb   : > { %v4482_v0 = vld [vmem:[%s7353_s1 + $0x18] sm:$0x1]  ;;  %vm385_vm0 = vcmask 1040384   ;;  %v4481_v1 = vld [vmem:[%s7353_s1 + $0x10] sm:$0xff]  ;;  %s189_s21 = scalar_select %p188_p3, %s5752_s16, 1  ;;  %vm276_vm1 = vcmask 72704  }
   0xc   : > { %5698 = vmatprep.subr.msk.mxu1 %vm385_vm0, %v4482_v0  ;;  %5176 = vmatprep.subr.msk.mxu0 %vm385_vm0, %v4482_v0  ;;  %v236_v2 = vld [vmem:[%s7353_s1 + $0x8] sm:$0x1]  ;;  %v235_v10 = vld [vmem:[%s7353_s1] sm:$0xff]  ;;  %v5810_v16 = vld [vmem:[%s7353_s1 + $0x38] sm:$0x1]  ;;  %s7358_s9 = smov (!%p194_p4, %s193_s9), 71 }
   0xd   : > { %5700 = vmatpush3.msk.msra.mxu1 %vm385_vm0, %v4482_v0  ;;  %5177 = vmatpush3.msk.msra.mxu0 %vm385_vm0, %v4482_v0  ;;  %v4558_v3 = vld [vmem:[%s7353_s1 + $0x28] sm:$0x1]  ;;  %s5702_s26 = smul.u32 328, %s189_s21  ;;  %v4557_v11 = vld [vmem:[%s7353_s1 + $0x20] sm:$0xff]  ;;  %v4596_v50 = vld [vmem:[%s7353_s1 + $0x30] sm:$0xff]  ;;  %s4480_s12 = sshll.u32 %s7358_s9, 3 }
   0xe   : > { %5699 = vmatprep.subr.mxu1 %v4481_v1  ;;  %5178 = vmatprep.subr.mxu0 %v4481_v1  ;;  %v5815_v17 = vld [vmem:[%s7353_s1 + $0x48] sm:$0x1]  ;;  %v4635_v51 = vld [vmem:[%s7353_s1 + $0x40] sm:$0xff]  ;;  %v5914_v56 = vld [vmem:[%s7353_s1 + $0x58] sm:$0x1]  ;;  %s7177_s18 = scalar_lea.vmem %s7356_s4, %s4480_s12  ;;  %vm4381_vm5 = vcmask 130048  }
   0xf   : > { %5701 = vmatpush3.msra.mxu1 %v4481_v1  ;;  %5179 = vmatpush3.msra.mxu0 %v4481_v1  ;;  %s5779_s29 = scalar_lea.vmem %s7352_s0, %s5702_s26  ;;  %v5919_v57 = vld [vmem:[%s7353_s1 + $0x68] sm:$0x1] }
  0x10   : > { %5234 = vmatprep.subr.msk.mxu1 %vm385_vm0, %v236_v2  ;;  %5292 = vmatprep.subr.msk.mxu0 %vm385_vm0, %v4558_v3  ;;  %v237_v4 = vld [vmem:[%s5779_s29 + $0x1] sm:$0xff]  ;;  %v255_v5 = vld [vmem:[%s5779_s29 + $0x91] sm:$0xff]  ;;  %v238_v6 = vld [vmem:[%s5779_s29 + $0x9] sm:$0xff] }
  0x11   : > { %5180 = vmatprep.mubr.msk.f32.mxu0 %vm276_vm1, %v237_v4  ;;  %5207 = vmatprep.mubr.msk.f32.mxu1 %vm276_vm1, %v255_v5  ;;  %v256_v7 = vld [vmem:[%s5779_s29 + $0x99] sm:$0xff]  ;;  %v239_v8 = vld [vmem:[%s5779_s29 + $0x11] sm:$0xff]  ;;  %v257_v9 = vld [vmem:[%s5779_s29 + $0xa1] sm:$0xff] }
  0x12   : > { %5181 = vmatmul.mubr.msk.f32.vlgmr.msra.gmra.mxu0 %vm276_vm1, %v238_v6  ;;  %5208 = vmatmul.mubr.msk.f32.vlgmr.msra.gmra.mxu1 %vm276_vm1, %v256_v7  ;;  %v240_v12 = vld [vmem:[%s5779_s29 + $0x19] sm:$0xff]  ;;  %v258_v13 = vld [vmem:[%s5779_s29 + $0xa9] sm:$0xff]  ;;  %v241_v14 = vld [vmem:[%s5779_s29 + $0x21] sm:$0xff] }
  0x13   : > { %5235 = vmatpush3.msk.msra.mxu1 %vm385_vm0, %v236_v2  ;;  %5293 = vmatpush3.msk.msra.mxu0 %vm385_vm0, %v4558_v3  ;;  %v259_v15 = vld [vmem:[%s5779_s29 + $0xb1] sm:$0xff]  ;;  %v242_v18 = vld [vmem:[%s5779_s29 + $0x29] sm:$0xff]  ;;  %v260_v19 = vld [vmem:[%s5779_s29 + $0xb9] sm:$0xff] }
  0x14   : > { %5183 = vmatprep.mubr.msk.f32.mxu0 %vm276_vm1, %v239_v8  ;;  %5210 = vmatprep.mubr.msk.f32.mxu1 %vm276_vm1, %v257_v9  ;;  %v243_v20 = vld [vmem:[%s5779_s29 + $0x31] sm:$0xff]  ;;  %v261_v21 = vld [vmem:[%s5779_s29 + $0xc1] sm:$0xff]  ;;  %v244_v22 = vld [vmem:[%s5779_s29 + $0x39] sm:$0xff] }
  0x15   : > { %5236 = vmatprep.subr.mxu1 %v235_v10  ;;  %5294 = vmatprep.subr.mxu0 %v4557_v11  ;;  %v262_v23 = vld [vmem:[%s5779_s29 + $0xc9] sm:$0xff]  ;;  %v245_v24 = vld [vmem:[%s5779_s29 + $0x41] sm:$0xff]  ;;  %v263_v25 = vld [vmem:[%s5779_s29 + $0xd1] sm:$0xff] }
  0x16   : > { %5184 = vmatmul.mubr.msk.f32.gmra.mxu0 %vm276_vm1, %v240_v12  ;;  %5211 = vmatmul.mubr.msk.f32.gmra.mxu1 %vm276_vm1, %v258_v13  ;;  %v246_v26 = vld [vmem:[%s5779_s29 + $0x49] sm:$0xff]  ;;  %v264_v27 = vld [vmem:[%s5779_s29 + $0xd9] sm:$0xff]  ;;  %v247_v28 = vld [vmem:[%s5779_s29 + $0x51] sm:$0xff] }
  0x17   : > { %5186 = vmatprep.mubr.msk.f32.mxu0 %vm276_vm1, %v241_v14  ;;  %5213 = vmatprep.mubr.msk.f32.mxu1 %vm276_vm1, %v259_v15  ;;  %v265_v29 = vld [vmem:[%s5779_s29 + $0xe1] sm:$0xff]  ;;  %v248_v30 = vld [vmem:[%s5779_s29 + $0x59] sm:$0xff]  ;;  %v266_v31 = vld [vmem:[%s5779_s29 + $0xe9] sm:$0xff] }
  0x18   : > { %5237 = vmatpush3.msra.mxu1 %v235_v10  ;;  %5295 = vmatpush3.msra.mxu0 %v4557_v11  ;;  %v249_v32 = vld [vmem:[%s5779_s29 + $0x61] sm:$0xff]  ;;  %v267_v33 = vld [vmem:[%s5779_s29 + $0xf1] sm:$0xff]  ;;  %v250_v34 = vld [vmem:[%s5779_s29 + $0x69] sm:$0xff] }
  0x19   : > { %5350 = vmatprep.subr.msk.mxu1 %vm385_vm0, %v5810_v16  ;;  %5408 = vmatprep.subr.msk.mxu0 %vm385_vm0, %v5815_v17  ;;  %v268_v35 = vld [vmem:[%s5779_s29 + $0xf9] sm:$0xff]  ;;  %v251_v36 = vld [vmem:[%s5779_s29 + $0x71] sm:$0xff]  ;;  %v269_v37 = vld [vmem:[%s5779_s29 + $0x101] sm:$0xff] }
  0x1a   : > { %5187 = vmatmul.mubr.msk.f32.gmra.mxu0 %vm276_vm1, %v242_v18  ;;  %5214 = vmatmul.mubr.msk.f32.gmra.mxu1 %vm276_vm1, %v260_v19  ;;  %v252_v38 = vld [vmem:[%s5779_s29 + $0x79] sm:$0xff]  ;;  %v270_v39 = vld [vmem:[%s5779_s29 + $0x109] sm:$0xff]  ;;  %v253_v40 = vld [vmem:[%s5779_s29 + $0x81] sm:$0xff] }
  0x1b   : > { %5189 = vmatprep.mubr.msk.f32.mxu0 %vm276_vm1, %v243_v20  ;;  %5216 = vmatprep.mubr.msk.f32.mxu1 %vm276_vm1, %v261_v21  ;;  %v271_v41 = vld [vmem:[%s5779_s29 + $0x111] sm:$0xff]  ;;  %v254_v42 = vld [vmem:[%s5779_s29 + $0x89] sm:$0xff]  ;;  %v272_v43 = vld [vmem:[%s5779_s29 + $0x119] sm:$0xff] }
  0x1c   : > { %v199_v44 = vld [vmem:[%s5779_s29] sm:$0xff]  ;;  %v200_v46 = vld [vmem:[%s5779_s29 + $0x8] sm:$0xff]  ;;  %v201_v48 = vld [vmem:[%s5779_s29 + $0x10] sm:$0xff] }
  0x1d   : > { %v990_v45 = vld [vmem:[%s5779_s29 + $0x2] sm:$0xff]  ;;  %v991_v47 = vld [vmem:[%s5779_s29 + $0xa] sm:$0xff]  ;;  %v5883_v49 = vld [vmem:[%s5779_s29 + $0x12] sm:$0xff] }
  0x1e   : > { %5190 = vmatmul.mubr.msk.f32.gmra.mxu0 %vm276_vm1, %v244_v22  ;;  %5217 = vmatmul.mubr.msk.f32.gmra.mxu1 %vm276_vm1, %v262_v23  ;;  %v202_v52 = vld [vmem:[%s5779_s29 + $0x18] sm:$0xff]  ;;  %v203_v54 = vld [vmem:[%s5779_s29 + $0x20] sm:$0xff]  ;;  %v204_v58 = vld [vmem:[%s5779_s29 + $0x28] sm:$0xff] }
  0x1f   : > { %5192 = vmatprep.mubr.msk.f32.mxu0 %vm276_vm1, %v245_v24  ;;  %5219 = vmatprep.mubr.msk.f32.mxu1 %vm276_vm1, %v263_v25  ;;  %v5899_v53 = vld [vmem:[%s5779_s29 + $0x1a] sm:$0xff]  ;;  %v5906_v55 = vld [vmem:[%s5779_s29 + $0x22] sm:$0xff]  ;;  %v5926_v59 = vld [vmem:[%s5779_s29 + $0x2a] sm:$0xff] }
  0x20   : > { %v205_v60 = vld [vmem:[%s5779_s29 + $0x30] sm:$0xff]  ;;  %v206_v62 = vld [vmem:[%s5779_s29 + $0x38] sm:$0xff]  ;;  %v207_v0 = vld [vmem:[%s5779_s29 + $0x40] sm:$0xff] }
  0x21   : > { %v5930_v61 = vld [vmem:[%s5779_s29 + $0x32] sm:$0xff]  ;;  %v5944_v63 = vld [vmem:[%s5779_s29 + $0x3a] sm:$0xff]  ;;  %v5948_v1 = vld [vmem:[%s5779_s29 + $0x42] sm:$0xff] }
  0x22   : > { %5193 = vmatmul.mubr.msk.f32.gmra.mxu0 %vm276_vm1, %v246_v26  ;;  %5220 = vmatmul.mubr.msk.f32.gmra.mxu1 %vm276_vm1, %v264_v27  ;;  %v208_v2 = vld [vmem:[%s5779_s29 + $0x48] sm:$0xff]  ;;  %v209_v4 = vld [vmem:[%s5779_s29 + $0x50] sm:$0xff]  ;;  %v210_v6 = vld [vmem:[%s5779_s29 + $0x58] sm:$0xff] }
  0x23   : > { %5195 = vmatprep.mubr.msk.f32.mxu0 %vm276_vm1, %v247_v28  ;;  %5222 = vmatprep.mubr.msk.f32.mxu1 %vm276_vm1, %v265_v29  ;;  %v5958_v3 = vld [vmem:[%s5779_s29 + $0x4a] sm:$0xff]  ;;  %v5962_v5 = vld [vmem:[%s5779_s29 + $0x52] sm:$0xff]  ;;  %v5972_v7 = vld [vmem:[%s5779_s29 + $0x5a] sm:$0xff] }
  0x24   : > { %v211_v8 = vld [vmem:[%s5779_s29 + $0x60] sm:$0xff]  ;;  %v212_v10 = vld [vmem:[%s5779_s29 + $0x68] sm:$0xff]  ;;  %v213_v12 = vld [vmem:[%s5779_s29 + $0x70] sm:$0xff] }
  0x25   : > { %v5976_v9 = vld [vmem:[%s5779_s29 + $0x62] sm:$0xff]  ;;  %v5986_v11 = vld [vmem:[%s5779_s29 + $0x6a] sm:$0xff]  ;;  %v5990_v13 = vld [vmem:[%s5779_s29 + $0x72] sm:$0xff] }
  0x26   : > { %5196 = vmatmul.mubr.msk.f32.gmra.mxu0 %vm276_vm1, %v248_v30  ;;  %5223 = vmatmul.mubr.msk.f32.gmra.mxu1 %vm276_vm1, %v266_v31  ;;  %v214_v14 = vld [vmem:[%s5779_s29 + $0x78] sm:$0xff]  ;;  %v216_v18 = vld [vmem:[%s5779_s29 + $0x88] sm:$0xff]  ;;  %v217_v20 = vld [vmem:[%s5779_s29 + $0x90] sm:$0xff] }
  0x27   : > { %5198 = vmatprep.mubr.msk.f32.mxu0 %vm276_vm1, %v249_v32  ;;  %5225 = vmatprep.mubr.msk.f32.mxu1 %vm276_vm1, %v267_v33  ;;  %v6000_v15 = vld [vmem:[%s5779_s29 + $0x7a] sm:$0xff]  ;;  %v6014_v19 = vld [vmem:[%s5779_s29 + $0x8a] sm:$0xff]  ;;  %v6018_v21 = vld [vmem:[%s5779_s29 + $0x92] sm:$0xff] }
  0x28   : > { %v218_v22 = vld [vmem:[%s5779_s29 + $0x98] sm:$0xff]  ;;  %v219_v24 = vld [vmem:[%s5779_s29 + $0xa0] sm:$0xff]  ;;  %v220_v26 = vld [vmem:[%s5779_s29 + $0xa8] sm:$0xff] }
  0x29   : > { %v6028_v23 = vld [vmem:[%s5779_s29 + $0x9a] sm:$0xff]  ;;  %v6032_v25 = vld [vmem:[%s5779_s29 + $0xa2] sm:$0xff]  ;;  %v6042_v27 = vld [vmem:[%s5779_s29 + $0xaa] sm:$0xff] }
  0x2a   : > { %5199 = vmatmul.mubr.msk.f32.gmra.mxu0 %vm276_vm1, %v250_v34  ;;  %5226 = vmatmul.mubr.msk.f32.gmra.mxu1 %vm276_vm1, %v268_v35  ;;  %v221_v28 = vld [vmem:[%s5779_s29 + $0xb0] sm:$0xff]  ;;  %v222_v30 = vld [vmem:[%s5779_s29 + $0xb8] sm:$0xff]  ;;  %v223_v32 = vld [vmem:[%s5779_s29 + $0xc0] sm:$0xff] }
  0x2b   : > { %5201 = vmatprep.mubr.msk.f32.mxu0 %vm276_vm1, %v251_v36  ;;  %5228 = vmatprep.mubr.msk.f32.mxu1 %vm276_vm1, %v269_v37  ;;  %v6046_v29 = vld [vmem:[%s5779_s29 + $0xb2] sm:$0xff]  ;;  %v6056_v31 = vld [vmem:[%s5779_s29 + $0xba] sm:$0xff]  ;;  %v6060_v33 = vld [vmem:[%s5779_s29 + $0xc2] sm:$0xff] }
  0x2c   : > { %v224_v34 = vld [vmem:[%s5779_s29 + $0xc8] sm:$0xff]  ;;  %v225_v36 = vld [vmem:[%s5779_s29 + $0xd0] sm:$0xff] }
  0x2d   : > { %v6070_v35 = vld [vmem:[%s5779_s29 + $0xca] sm:$0xff]  ;;  %v6074_v37 = vld [vmem:[%s5779_s29 + $0xd2] sm:$0xff] }
  0x2e   : > { %5202 = vmatmul.mubr.msk.f32.gmra.mxu0 %vm276_vm1, %v252_v38  ;;  %5229 = vmatmul.mubr.msk.f32.gmra.mxu1 %vm276_vm1, %v270_v39  ;;  %v226_v38 = vld [vmem:[%s5779_s29 + $0xd8] sm:$0xff] }
  0x2f   : > { %5204 = vmatprep.mubr.msk.f32.mxu0 %vm276_vm1, %v253_v40  ;;  %5231 = vmatprep.mubr.msk.f32.mxu1 %vm276_vm1, %v271_v41  ;;  %v6084_v39 = vld [vmem:[%s5779_s29 + $0xda] sm:$0xff]  ;;  %v6088_v41 = vld [vmem:[%s5779_s29 + $0xe2] sm:$0xff] }
  0x30   : > { %v227_v40 = vld [vmem:[%s5779_s29 + $0xe0] sm:$0xff] }
  0x32   : > { %5205 = vmatmul.mubr.msk.f32.gmra.mxu0 %vm276_vm1, %v254_v42  ;;  %5232 = vmatmul.mubr.msk.f32.gmra.mxu1 %vm276_vm1, %v272_v43  ;;  %v228_v42 = vld [vmem:[%s5779_s29 + $0xe8] sm:$0xff] }
  0x33   : > { %5238 = vmatprep.mubr.msk.f32.mxu1 %vm276_vm1, %v199_v44  ;;  %5296 = vmatprep.mubr.msk.f32.mxu0 %vm276_vm1, %v990_v45  ;;  %v6098_v43 = vld [vmem:[%s5779_s29 + $0xea] sm:$0xff]  ;;  %v6102_v45 = vld [vmem:[%s5779_s29 + $0xf2] sm:$0xff] }
  0x34   : > { %v229_v44 = vld [vmem:[%s5779_s29 + $0xf0] sm:$0xff] }
  0x36   : > { %5239 = vmatmul.mubr.msk.f32.vlgmr.msra.gmra.mxu1 %vm276_vm1, %v200_v46  ;;  %5297 = vmatmul.mubr.msk.f32.vlgmr.msra.gmra.mxu0 %vm276_vm1, %v991_v47  ;;  %v230_v46 = vld [vmem:[%s5779_s29 + $0xf8] sm:$0xff] }
  0x37   : > { %5351 = vmatpush3.msk.msra.mxu1 %vm385_vm0, %v5810_v16  ;;  %5409 = vmatpush3.msk.msra.mxu0 %vm385_vm0, %v5815_v17  ;;  %v215_v16 = vld [vmem:[%s5779_s29 + $0x80] sm:$0xff] }
  0x38   : > { %5241 = vmatprep.mubr.msk.f32.mxu1 %vm276_vm1, %v201_v48  ;;  %5299 = vmatprep.mubr.msk.f32.mxu0 %vm276_vm1, %v5883_v49  ;;  %v6004_v17 = vld [vmem:[%s5779_s29 + $0x82] sm:$0xff]  ;;  %v6112_v47 = vld [vmem:[%s5779_s29 + $0xfa] sm:$0xff] }
  0x39   : > { %5352 = vmatprep.subr.mxu1 %v4596_v50  ;;  %5410 = vmatprep.subr.mxu0 %v4635_v51  ;;  %v231_v48 = vld [vmem:[%s5779_s29 + $0x100] sm:$0xff] }
  0x3a   : > { %5242 = vmatmul.mubr.msk.f32.gmra.mxu1 %vm276_vm1, %v202_v52  ;;  %5300 = vmatmul.mubr.msk.f32.gmra.mxu0 %vm276_vm1, %v5899_v53  ;;  %v6126_v52 = vld [vmem:[%s5779_s29 + $0x10a] sm:$0xff] }
  0x3b   : > { %5244 = vmatprep.mubr.msk.f32.mxu1 %vm276_vm1, %v203_v54  ;;  %5302 = vmatprep.mubr.msk.f32.mxu0 %vm276_vm1, %v5906_v55  ;;  %v233_v54 = vld [vmem:[%s5779_s29 + $0x110] sm:$0xff] }
  0x3c   : > { %5353 = vmatpush3.msra.mxu1 %v4596_v50  ;;  %5411 = vmatpush3.msra.mxu0 %v4635_v51  ;;  %v6116_v50 = vld [vmem:[%s5779_s29 + $0x102] sm:$0xff] }
  0x3d   : > { %5466 = vmatprep.subr.msk.mxu1 %vm385_vm0, %v5914_v56  ;;  %5524 = vmatprep.subr.msk.mxu0 %vm385_vm0, %v5919_v57  ;;  %v232_v51 = vld [vmem:[%s5779_s29 + $0x108] sm:$0xff] }
  0x3e   : > { %5245 = vmatmul.mubr.msk.f32.gmra.mxu1 %vm276_vm1, %v204_v58  ;;  %5303 = vmatmul.mubr.msk.f32.gmra.mxu0 %vm276_vm1, %v5926_v59  ;;  %v6130_v58 = vld [vmem:[%s5779_s29 + $0x112] sm:$0xff] }
  0x3f   : > { %5247 = vmatprep.mubr.msk.f32.mxu1 %vm276_vm1, %v205_v60  ;;  %5305 = vmatprep.mubr.msk.f32.mxu0 %vm276_vm1, %v5930_v61  ;;  %v234_v60 = vld [vmem:[%s5779_s29 + $0x118] sm:$0xff] }
  0x42   : > { %5248 = vmatmul.mubr.msk.f32.gmra.mxu1 %vm276_vm1, %v206_v62  ;;  %5306 = vmatmul.mubr.msk.f32.gmra.mxu0 %vm276_vm1, %v5944_v63  ;;  %v6140_v62 = vld [vmem:[%s5779_s29 + $0x11a] sm:$0xff] }
  0x43   : > { %5250 = vmatprep.mubr.msk.f32.mxu1 %vm276_vm1, %v207_v0  ;;  %5308 = vmatprep.mubr.msk.f32.mxu0 %vm276_vm1, %v5948_v1  ;;  %v1852_v0 = vld [vmem:[%s5779_s29 + $0x13] sm:$0xff] }
  0x46   : > { %5251 = vmatmul.mubr.msk.f32.gmra.mxu1 %vm276_vm1, %v208_v2  ;;  %5309 = vmatmul.mubr.msk.f32.gmra.mxu0 %vm276_vm1, %v5958_v3  ;;  %v1853_v2 = vld [vmem:[%s5779_s29 + $0x1b] sm:$0xff] }
  0x47   : > { %5253 = vmatprep.mubr.msk.f32.mxu1 %vm276_vm1, %v209_v4  ;;  %5311 = vmatprep.mubr.msk.f32.mxu0 %vm276_vm1, %v5962_v5  ;;  %v1854_v4 = vld [vmem:[%s5779_s29 + $0x23] sm:$0xff] }
  0x4a   : > { %5254 = vmatmul.mubr.msk.f32.gmra.mxu1 %vm276_vm1, %v210_v6  ;;  %5312 = vmatmul.mubr.msk.f32.gmra.mxu0 %vm276_vm1, %v5972_v7  ;;  %v4674_v6 = vld [vmem:[%s7353_s1 + $0x50] sm:$0xff] }
  0x4b   : > { %5256 = vmatprep.mubr.msk.f32.mxu1 %vm276_vm1, %v211_v8  ;;  %5314 = vmatprep.mubr.msk.f32.mxu0 %vm276_vm1, %v5976_v9  ;;  %v4713_v8 = vld [vmem:[%s7353_s1 + $0x60] sm:$0xff] }
  0x4e   : > { %5257 = vmatmul.mubr.msk.f32.gmra.mxu1 %vm276_vm1, %v212_v10  ;;  %5315 = vmatmul.mubr.msk.f32.gmra.mxu0 %vm276_vm1, %v5986_v11  ;;  %v1860_v10 = vld [vmem:[%s5779_s29 + $0x53] sm:$0xff] }
  0x4f   : > { %5259 = vmatprep.mubr.msk.f32.mxu1 %vm276_vm1, %v213_v12  ;;  %5317 = vmatprep.mubr.msk.f32.mxu0 %vm276_vm1, %v5990_v13  ;;  %v1862_v12 = vld [vmem:[%s5779_s29 + $0x63] sm:$0xff] }
  0x52   : > { %5260 = vmatmul.mubr.msk.f32.gmra.mxu1 %vm276_vm1, %v214_v14  ;;  %5318 = vmatmul.mubr.msk.f32.gmra.mxu0 %vm276_vm1, %v6000_v15  ;;  %v1870_v14 = vld [vmem:[%s5779_s29 + $0xa3] sm:$0xff] }
  0x53   : > { %5262 = vmatprep.mubr.msk.f32.mxu1 %vm276_vm1, %v215_v16  ;;  %5320 = vmatprep.mubr.msk.f32.mxu0 %vm276_vm1, %v6004_v17  ;;  %v1872_v16 = vld [vmem:[%s5779_s29 + $0xb3] sm:$0xff] }
  0x56   : > { %5263 = vmatmul.mubr.msk.f32.gmra.mxu1 %vm276_vm1, %v216_v18  ;;  %5321 = vmatmul.mubr.msk.f32.gmra.mxu0 %vm276_vm1, %v6014_v19  ;;  %v1874_v18 = vld [vmem:[%s5779_s29 + $0xc3] sm:$0xff] }
  0x57   : > { %5265 = vmatprep.mubr.msk.f32.mxu1 %vm276_vm1, %v217_v20  ;;  %5323 = vmatprep.mubr.msk.f32.mxu0 %vm276_vm1, %v6018_v21  ;;  %v1876_v20 = vld [vmem:[%s5779_s29 + $0xd3] sm:$0xff] }
  0x5a   : > { %5266 = vmatmul.mubr.msk.f32.gmra.mxu1 %vm276_vm1, %v218_v22  ;;  %5324 = vmatmul.mubr.msk.f32.gmra.mxu0 %vm276_vm1, %v6028_v23  ;;  %v1878_v22 = vld [vmem:[%s5779_s29 + $0xe3] sm:$0xff] }
  0x5b   : > { %5268 = vmatprep.mubr.msk.f32.mxu1 %vm276_vm1, %v219_v24  ;;  %5326 = vmatprep.mubr.msk.f32.mxu0 %vm276_vm1, %v6032_v25  ;;  %v1880_v24 = vld [vmem:[%s5779_s29 + $0xf3] sm:$0xff] }
  0x5e   : > { %5269 = vmatmul.mubr.msk.f32.gmra.mxu1 %vm276_vm1, %v220_v26  ;;  %5327 = vmatmul.mubr.msk.f32.gmra.mxu0 %vm276_vm1, %v6042_v27  ;;  %v1882_v26 = vld [vmem:[%s5779_s29 + $0x103] sm:$0xff] }
  0x5f   : > { %5271 = vmatprep.mubr.msk.f32.mxu1 %vm276_vm1, %v221_v28  ;;  %5329 = vmatprep.mubr.msk.f32.mxu0 %vm276_vm1, %v6046_v29  ;;  %v1884_v28 = vld [vmem:[%s5779_s29 + $0x113] sm:$0xff] }
  0x62   : > { %5272 = vmatmul.mubr.msk.f32.gmra.mxu1 %vm276_vm1, %v222_v30  ;;  %5330 = vmatmul.mubr.msk.f32.gmra.mxu0 %vm276_vm1, %v6056_v31  ;;  %v1455_v30 = vld [vmem:[%s5779_s29 + $0x122] sm:$0xff] }
  0x63   : > { %5274 = vmatprep.mubr.msk.f32.mxu1 %vm276_vm1, %v223_v32  ;;  %5332 = vmatprep.mubr.msk.f32.mxu0 %vm276_vm1, %v6060_v33  ;;  %v1456_v32 = vld [vmem:[%s5779_s29 + $0x12a] sm:$0xff] }
  0x66   : > { %5275 = vmatmul.mubr.msk.f32.gmra.mxu1 %vm276_vm1, %v224_v34  ;;  %5333 = vmatmul.mubr.msk.f32.gmra.mxu0 %vm276_vm1, %v6070_v35  ;;  %v2283_v34 = vld [vmem:[%s5779_s29 + $0x14] sm:$0xff] }
  0x67   : > { %5277 = vmatprep.mubr.msk.f32.mxu1 %vm276_vm1, %v225_v36  ;;  %5335 = vmatprep.mubr.msk.f32.mxu0 %vm276_vm1, %v6074_v37  ;;  %v2284_v36 = vld [vmem:[%s5779_s29 + $0x1c] sm:$0xff] }
  0x6a   : > { %5278 = vmatmul.mubr.msk.f32.gmra.mxu1 %vm276_vm1, %v226_v38  ;;  %5336 = vmatmul.mubr.msk.f32.gmra.mxu0 %vm276_vm1, %v6084_v39  ;;  %v2716_v38 = vld [vmem:[%s5779_s29 + $0x34] sm:$0xff] }
  0x6b   : > { %5280 = vmatprep.mubr.msk.f32.mxu1 %vm276_vm1, %v227_v40  ;;  %5338 = vmatprep.mubr.msk.f32.mxu0 %vm276_vm1, %v6088_v41  ;;  %v4791_v40 = vld [vmem:[%s7353_s1 + $0x80] sm:$0xff] }
  0x6e   : > { %5281 = vmatmul.mubr.msk.f32.gmra.mxu1 %vm276_vm1, %v228_v42  ;;  %5339 = vmatmul.mubr.msk.f32.gmra.mxu0 %vm276_vm1, %v6098_v43  ;;  %v2718_v42 = vld [vmem:[%s5779_s29 + $0x44] sm:$0xff] }
  0x6f   : > { %5283 = vmatprep.mubr.msk.f32.mxu1 %vm276_vm1, %v229_v44  ;;  %5341 = vmatprep.mubr.msk.f32.mxu0 %vm276_vm1, %v6102_v45  ;;  %v2720_v44 = vld [vmem:[%s5779_s29 + $0x54] sm:$0xff] }
  0x72   : > { %5284 = vmatmul.mubr.msk.f32.gmra.mxu1 %vm276_vm1, %v230_v46  ;;  %5342 = vmatmul.mubr.msk.f32.gmra.mxu0 %vm276_vm1, %v6112_v47  ;;  %v2722_v46 = vld [vmem:[%s5779_s29 + $0x64] sm:$0xff] }
  0x73   : > { %5286 = vmatprep.mubr.msk.f32.mxu1 %vm276_vm1, %v231_v48  ;;  %5344 = vmatprep.mubr.msk.f32.mxu0 %vm276_vm1, %v6116_v50 }
  0x76   : > { %5287 = vmatmul.mubr.msk.f32.gmra.mxu1 %vm276_vm1, %v232_v51  ;;  %5345 = vmatmul.mubr.msk.f32.gmra.mxu0 %vm276_vm1, %v6126_v52 }
  0x77   : > { %5289 = vmatprep.mubr.msk.f32.mxu1 %vm276_vm1, %v233_v54  ;;  %5347 = vmatprep.mubr.msk.f32.mxu0 %vm276_vm1, %v6130_v58  ;;  %v2724_v54 = vld [vmem:[%s5779_s29 + $0x74] sm:$0xff] }
  0x7a   : > { %5290 = vmatmul.mubr.msk.f32.gmra.mxu1 %vm276_vm1, %v234_v60  ;;  %5348 = vmatmul.mubr.msk.f32.gmra.mxu0 %vm276_vm1, %v6140_v62 }
  0x7b   : > { %5354 = vmatprep.mubr.msk.f32.mxu1 %vm276_vm1, %v5883_v49  ;;  %5412 = vmatprep.mubr.msk.f32.mxu0 %vm276_vm1, %v1852_v0  ;;  %v1855_v49 = vld [vmem:[%s5779_s29 + $0x2b] sm:$0xff] }
  0x7e   : > { %5355 = vmatmul.mubr.msk.f32.vlgmr.msra.gmra.mxu1 %vm276_vm1, %v5899_v53  ;;  %5413 = vmatmul.mubr.msk.f32.vlgmr.msra.gmra.mxu0 %vm276_vm1, %v1853_v2  ;;  %v1856_v53 = vld [vmem:[%s5779_s29 + $0x33] sm:$0xff] }
  0x7f   : > { %5467 = vmatpush3.msk.msra.mxu1 %vm385_vm0, %v5914_v56  ;;  %5525 = vmatpush3.msk.msra.mxu0 %vm385_vm0, %v5919_v57  ;;  %v6175_v56 = vld [vmem:[%s7353_s1 + $0x78] sm:$0x1]  ;;  %v1857_v57 = vld [vmem:[%s5779_s29 + $0x3b] sm:$0xff] }
  0x80   : > { %5357 = vmatprep.mubr.msk.f32.mxu1 %vm276_vm1, %v5906_v55  ;;  %5415 = vmatprep.mubr.msk.f32.mxu0 %vm276_vm1, %v1854_v4  ;;  %v6180_v55 = vld [vmem:[%s7353_s1 + $0x88] sm:$0x1] }
  0x81   : > { %5468 = vmatprep.subr.mxu1 %v4674_v6  ;;  %5526 = vmatprep.subr.mxu0 %v4713_v8  ;;  %v2726_v4 = vld [vmem:[%s5779_s29 + $0x84] sm:$0xff] }
  0x82   : > { %5358 = vmatmul.mubr.msk.f32.gmra.mxu1 %vm276_vm1, %v5926_v59  ;;  %5416 = vmatmul.mubr.msk.f32.gmra.mxu0 %vm276_vm1, %v1855_v49  ;;  %v1858_v59 = vld [vmem:[%s5779_s29 + $0x43] sm:$0xff]  ;;  %v2727_v49 = vld [vmem:[%s5779_s29 + $0x8c] sm:$0xff] }
  0x83   : > { %5360 = vmatprep.mubr.msk.f32.mxu1 %vm276_vm1, %v5930_v61  ;;  %5418 = vmatprep.mubr.msk.f32.mxu0 %vm276_vm1, %v1856_v53  ;;  %v1859_v61 = vld [vmem:[%s5779_s29 + $0x4b] sm:$0xff] }
  0x84   : > { %5469 = vmatpush3.msra.mxu1 %v4674_v6  ;;  %5527 = vmatpush3.msra.mxu0 %v4713_v8 }
  0x85   : > { %5582 = vmatprep.subr.msk.mxu1 %vm385_vm0, %v6175_v56  ;;  %5640 = vmatprep.subr.msk.mxu0 %vm385_vm0, %v6180_v55 }
  0x86   : > { %5361 = vmatmul.mubr.msk.f32.gmra.mxu1 %vm276_vm1, %v5944_v63  ;;  %5419 = vmatmul.mubr.msk.f32.gmra.mxu0 %vm276_vm1, %v1857_v57  ;;  %v1861_v63 = vld [vmem:[%s5779_s29 + $0x5b] sm:$0xff] }
  0x87   : > { %5363 = vmatprep.mubr.msk.f32.mxu1 %vm276_vm1, %v5948_v1  ;;  %5421 = vmatprep.mubr.msk.f32.mxu0 %vm276_vm1, %v1858_v59  ;;  %v1863_v1 = vld [vmem:[%s5779_s29 + $0x6b] sm:$0xff] }
  0x8a   : > { %5364 = vmatmul.mubr.msk.f32.gmra.mxu1 %vm276_vm1, %v5958_v3  ;;  %5422 = vmatmul.mubr.msk.f32.gmra.mxu0 %vm276_vm1, %v1859_v61  ;;  %v1864_v3 = vld [vmem:[%s5779_s29 + $0x73] sm:$0xff]  ;;  %v2729_v61 = vld [vmem:[%s5779_s29 + $0x9c] sm:$0xff] }
  0x8b   : > { %5366 = vmatprep.mubr.msk.f32.mxu1 %vm276_vm1, %v5962_v5  ;;  %5424 = vmatprep.mubr.msk.f32.mxu0 %vm276_vm1, %v1860_v10  ;;  %v1865_v5 = vld [vmem:[%s5779_s29 + $0x7b] sm:$0xff] }
  0x8e   : > { %5367 = vmatmul.mubr.msk.f32.gmra.mxu1 %vm276_vm1, %v5972_v7  ;;  %5425 = vmatmul.mubr.msk.f32.gmra.mxu0 %vm276_vm1, %v1861_v63  ;;  %v1866_v7 = vld [vmem:[%s5779_s29 + $0x83] sm:$0xff] }
  0x8f   : > { %5369 = vmatprep.mubr.msk.f32.mxu1 %vm276_vm1, %v5976_v9  ;;  %5427 = vmatprep.mubr.msk.f32.mxu0 %vm276_vm1, %v1862_v12  ;;  %v1867_v9 = vld [vmem:[%s5779_s29 + $0x8b] sm:$0xff] }
  0x90   : > { %v2730_v12 = vld [vmem:[%s5779_s29 + $0xa4] sm:$0xff] }
  0x92   : > { %5370 = vmatmul.mubr.msk.f32.gmra.mxu1 %vm276_vm1, %v5986_v11  ;;  %5428 = vmatmul.mubr.msk.f32.gmra.mxu0 %vm276_vm1, %v1863_v1  ;;  %v1868_v11 = vld [vmem:[%s5779_s29 + $0x93] sm:$0xff] }
  0x93   : > { %5372 = vmatprep.mubr.msk.f32.mxu1 %vm276_vm1, %v5990_v13  ;;  %5430 = vmatprep.mubr.msk.f32.mxu0 %vm276_vm1, %v1864_v3  ;;  %v1869_v13 = vld [vmem:[%s5779_s29 + $0x9b] sm:$0xff] }
  0x96   : > { %5373 = vmatmul.mubr.msk.f32.gmra.mxu1 %vm276_vm1, %v6000_v15  ;;  %5431 = vmatmul.mubr.msk.f32.gmra.mxu0 %vm276_vm1, %v1865_v5  ;;  %v1871_v15 = vld [vmem:[%s5779_s29 + $0xab] sm:$0xff] }
  0x97   : > { %5375 = vmatprep.mubr.msk.f32.mxu1 %vm276_vm1, %v6004_v17  ;;  %5433 = vmatprep.mubr.msk.f32.mxu0 %vm276_vm1, %v1866_v7  ;;  %v1873_v17 = vld [vmem:[%s5779_s29 + $0xbb] sm:$0xff]  ;;  %v2731_v5 = vld [vmem:[%s5779_s29 + $0xac] sm:$0xff] }
  0x9a   : > { %5376 = vmatmul.mubr.msk.f32.gmra.mxu1 %vm276_vm1, %v6014_v19  ;;  %5434 = vmatmul.mubr.msk.f32.gmra.mxu0 %vm276_vm1, %v1867_v9  ;;  %v1875_v19 = vld [vmem:[%s5779_s29 + $0xcb] sm:$0xff] }
  0x9b   : > { %5378 = vmatprep.mubr.msk.f32.mxu1 %vm276_vm1, %v6018_v21  ;;  %5436 = vmatprep.mubr.msk.f32.mxu0 %vm276_vm1, %v1868_v11  ;;  %v1877_v21 = vld [vmem:[%s5779_s29 + $0xdb] sm:$0xff] }
  0x9c   : > { %v2732_v11 = vld [vmem:[%s5779_s29 + $0xb4] sm:$0xff] }
  0x9e   : > { %5379 = vmatmul.mubr.msk.f32.gmra.mxu1 %vm276_vm1, %v6028_v23  ;;  %5437 = vmatmul.mubr.msk.f32.gmra.mxu0 %vm276_vm1, %v1869_v13  ;;  %v1879_v23 = vld [vmem:[%s5779_s29 + $0xeb] sm:$0xff] }
  0x9f   : > { %5381 = vmatprep.mubr.msk.f32.mxu1 %vm276_vm1, %v6032_v25  ;;  %5439 = vmatprep.mubr.msk.f32.mxu0 %vm276_vm1, %v1870_v14  ;;  %v1881_v25 = vld [vmem:[%s5779_s29 + $0xfb] sm:$0xff] }
  0xa2   : > { %5382 = vmatmul.mubr.msk.f32.gmra.mxu1 %vm276_vm1, %v6042_v27  ;;  %5440 = vmatmul.mubr.msk.f32.gmra.mxu0 %vm276_vm1, %v1871_v15  ;;  %v1883_v27 = vld [vmem:[%s5779_s29 + $0x10b] sm:$0xff]  ;;  %v2733_v15 = vld [vmem:[%s5779_s29 + $0xbc] sm:$0xff] }
  0xa3   : > { %5384 = vmatprep.mubr.msk.f32.mxu1 %vm276_vm1, %v6046_v29  ;;  %5442 = vmatprep.mubr.msk.f32.mxu0 %vm276_vm1, %v1872_v16  ;;  %v1885_v29 = vld [vmem:[%s5779_s29 + $0x11b] sm:$0xff] }
  0xa6   : > { %5385 = vmatmul.mubr.msk.f32.gmra.mxu1 %vm276_vm1, %v6056_v31  ;;  %5443 = vmatmul.mubr.msk.f32.gmra.mxu0 %vm276_vm1, %v1873_v17  ;;  %v1886_v31 = vld [vmem:[%s5779_s29 + $0x123] sm:$0xff] }
  0xa7   : > { %5387 = vmatprep.mubr.msk.f32.mxu1 %vm276_vm1, %v6060_v33  ;;  %5445 = vmatprep.mubr.msk.f32.mxu0 %vm276_vm1, %v1874_v18  ;;  %v1887_v33 = vld [vmem:[%s5779_s29 + $0x12b] sm:$0xff] }
  0xa8   : > { %v2734_v18 = vld [vmem:[%s5779_s29 + $0xc4] sm:$0xff] }
  0xaa   : > { %5388 = vmatmul.mubr.msk.f32.gmra.mxu1 %vm276_vm1, %v6070_v35  ;;  %5446 = vmatmul.mubr.msk.f32.gmra.mxu0 %vm276_vm1, %v1875_v19  ;;  %v2714_v35 = vld [vmem:[%s5779_s29 + $0x24] sm:$0xff] }
  0xab   : > { %5390 = vmatprep.mubr.msk.f32.mxu1 %vm276_vm1, %v6074_v37  ;;  %5448 = vmatprep.mubr.msk.f32.mxu0 %vm276_vm1, %v1876_v20  ;;  %v2715_v37 = vld [vmem:[%s5779_s29 + $0x2c] sm:$0xff] }
  0xae   : > { %5391 = vmatmul.mubr.msk.f32.gmra.mxu1 %vm276_vm1, %v6084_v39  ;;  %5449 = vmatmul.mubr.msk.f32.gmra.mxu0 %vm276_vm1, %v1877_v21  ;;  %v4752_v39 = vld [vmem:[%s7353_s1 + $0x70] sm:$0xff] }
  0xaf   : > { %5393 = vmatprep.mubr.msk.f32.mxu1 %vm276_vm1, %v6088_v41  ;;  %5451 = vmatprep.mubr.msk.f32.mxu0 %vm276_vm1, %v1878_v22  ;;  %v2717_v41 = vld [vmem:[%s5779_s29 + $0x3c] sm:$0xff]  ;;  %v2735_v21 = vld [vmem:[%s5779_s29 + $0xcc] sm:$0xff] }
  0xb2   : > { %5394 = vmatmul.mubr.msk.f32.gmra.mxu1 %vm276_vm1, %v6098_v43  ;;  %5452 = vmatmul.mubr.msk.f32.gmra.mxu0 %vm276_vm1, %v1879_v23  ;;  %v2719_v43 = vld [vmem:[%s5779_s29 + $0x4c] sm:$0xff] }
  0xb3   : > { %5396 = vmatprep.mubr.msk.f32.mxu1 %vm276_vm1, %v6102_v45  ;;  %5454 = vmatprep.mubr.msk.f32.mxu0 %vm276_vm1, %v1880_v24  ;;  %v2721_v45 = vld [vmem:[%s5779_s29 + $0x5c] sm:$0xff]  ;;  %v2736_v24 = vld [vmem:[%s5779_s29 + $0xd4] sm:$0xff] }
  0xb6   : > { %5397 = vmatmul.mubr.msk.f32.gmra.mxu1 %vm276_vm1, %v6112_v47  ;;  %5455 = vmatmul.mubr.msk.f32.gmra.mxu0 %vm276_vm1, %v1881_v25 }
  0xb7   : > { %5399 = vmatprep.mubr.msk.f32.mxu1 %vm276_vm1, %v6116_v50  ;;  %5457 = vmatprep.mubr.msk.f32.mxu0 %vm276_vm1, %v1882_v26  ;;  %v2723_v50 = vld [vmem:[%s5779_s29 + $0x6c] sm:$0xff] }
  0xba   : > { %5400 = vmatmul.mubr.msk.f32.gmra.mxu1 %vm276_vm1, %v6126_v52  ;;  %5458 = vmatmul.mubr.msk.f32.gmra.mxu0 %vm276_vm1, %v1883_v27  ;;  %v2737_v27 = vld [vmem:[%s5779_s29 + $0xdc] sm:$0xff] }
  0xbb   : > { %5402 = vmatprep.mubr.msk.f32.mxu1 %vm276_vm1, %v6130_v58  ;;  %5460 = vmatprep.mubr.msk.f32.mxu0 %vm276_vm1, %v1884_v28 }
  0xbe   : > { %5403 = vmatmul.mubr.msk.f32.gmra.mxu1 %vm276_vm1, %v6140_v62  ;;  %5461 = vmatmul.mubr.msk.f32.gmra.mxu0 %vm276_vm1, %v1885_v29  ;;  %v2725_v62 = vld [vmem:[%s5779_s29 + $0x7c] sm:$0xff] }
  0xbf   : > { %5405 = vmatprep.mubr.msk.f32.mxu1 %vm276_vm1, %v1455_v30  ;;  %5463 = vmatprep.mubr.msk.f32.mxu0 %vm276_vm1, %v1886_v31  ;;  %v2738_v30 = vld [vmem:[%s5779_s29 + $0xe4] sm:$0xff] }
  0xc2   : > { %5406 = vmatmul.mubr.msk.f32.gmra.mxu1 %vm276_vm1, %v1456_v32  ;;  %5464 = vmatmul.mubr.msk.f32.gmra.mxu0 %vm276_vm1, %v1887_v33  ;;  %v2739_v33 = vld [vmem:[%s5779_s29 + $0xec] sm:$0xff] }
  0xc3   : > { %5470 = vmatprep.mubr.msk.f32.mxu1 %vm276_vm1, %v2283_v34  ;;  %5528 = vmatprep.mubr.msk.f32.mxu0 %vm276_vm1, %v2714_v35 }
  0xc6   : > { %5471 = vmatmul.mubr.msk.f32.vlgmr.msra.gmra.mxu1 %vm276_vm1, %v2284_v36  ;;  %5529 = vmatmul.mubr.msk.f32.vlgmr.msra.gmra.mxu0 %vm276_vm1, %v2715_v37  ;;  %v2740_v36 = vld [vmem:[%s5779_s29 + $0xf4] sm:$0xff] }
  0xc7   : > { %5583 = vmatpush3.msk.msra.mxu1 %vm385_vm0, %v6175_v56  ;;  %5641 = vmatpush3.msk.msra.mxu0 %vm385_vm0, %v6180_v55  ;;  %v2728_v55 = vld [vmem:[%s5779_s29 + $0x94] sm:$0xff] }
  0xc8   : > { %5473 = vmatprep.mubr.msk.f32.mxu1 %vm276_vm1, %v2714_v35  ;;  %5531 = vmatprep.mubr.msk.f32.mxu0 %vm276_vm1, %v2716_v38 }
  0xc9   : > { %5584 = vmatprep.subr.mxu1 %v4752_v39  ;;  %5642 = vmatprep.subr.mxu0 %v4791_v40 }
  0xca   : > { %5474 = vmatmul.mubr.msk.f32.gmra.mxu1 %vm276_vm1, %v2715_v37  ;;  %5532 = vmatmul.mubr.msk.f32.gmra.mxu0 %vm276_vm1, %v2717_v41 }
  0xcb   : > { %5476 = vmatprep.mubr.msk.f32.mxu1 %vm276_vm1, %v2716_v38  ;;  %5534 = vmatprep.mubr.msk.f32.mxu0 %vm276_vm1, %v2718_v42 }
  0xcc   : > { %5585 = vmatpush3.msra.mxu1 %v4752_v39  ;;  %5643 = vmatpush3.msra.mxu0 %v4791_v40  ;;  %v2741_v40 = vld [vmem:[%s5779_s29 + $0xfc] sm:$0xff] }
  0xce   : > { %5477 = vmatmul.mubr.msk.f32.gmra.mxu1 %vm276_vm1, %v2717_v41  ;;  %5535 = vmatmul.mubr.msk.f32.gmra.mxu0 %vm276_vm1, %v2719_v43 }
  0xcf   : > { %5479 = vmatprep.mubr.msk.f32.mxu1 %vm276_vm1, %v2718_v42  ;;  %5537 = vmatprep.mubr.msk.f32.mxu0 %vm276_vm1, %v2720_v44 }
  0xd2   : > { %v6348_v47 = vpop.f32.mrf.mxu0  ;;  %v6350_v48 = vpop.f32.mrf.mxu1  ;;  %5480 = vmatmul.mubr.msk.f32.gmra.mxu1 %vm276_vm1, %v2719_v43  ;;  %5538 = vmatmul.mubr.msk.f32.gmra.mxu0 %vm276_vm1, %v2721_v45  ;;  %v2742_v43 = vld [vmem:[%s5779_s29 + $0x104] sm:$0xff] }
  0xd3   : > { %5482 = vmatprep.mubr.msk.f32.mxu1 %vm276_vm1, %v2720_v44  ;;  %5540 = vmatprep.mubr.msk.f32.mxu0 %vm276_vm1, %v2722_v46 }
  0xd4   : > { %v6357_v51 = vpop.f32.mrf.mxu0  ;;  %v6359_v52 = vpop.f32.mrf.mxu1 }
  0xd6   : > { %v6362_v58 = vpop.f32.mrf.mxu0  ;;  %v6364_v60 = vpop.f32.mrf.mxu1  ;;  %5483 = vmatmul.mubr.msk.f32.gmra.mxu1 %vm276_vm1, %v2721_v45  ;;  %5541 = vmatmul.mubr.msk.f32.gmra.mxu0 %vm276_vm1, %v2723_v50 }
  0xd7   : > { %5485 = vmatprep.mubr.msk.f32.mxu1 %vm276_vm1, %v2722_v46  ;;  %5543 = vmatprep.mubr.msk.f32.mxu0 %vm276_vm1, %v2724_v54 }
  0xd8   : > { %v6371_v0 = vpop.f32.mrf.mxu0  ;;  %v6373_v2 = vpop.f32.mrf.mxu1 }
  0xda   : > { %v6376_v6 = vpop.f32.mrf.mxu0  ;;  %v6378_v8 = vpop.f32.mrf.mxu1  ;;  %5486 = vmatmul.mubr.msk.f32.gmra.mxu1 %vm276_vm1, %v2723_v50  ;;  %5544 = vmatmul.mubr.msk.f32.gmra.mxu0 %vm276_vm1, %v2725_v62 }
  0xdb   : > { %5488 = vmatprep.mubr.msk.f32.mxu1 %vm276_vm1, %v2724_v54  ;;  %5546 = vmatprep.mubr.msk.f32.mxu0 %vm276_vm1, %v2726_v4 }
  0xdc   : > { %v6385_v53 = vpop.f32.mrf.mxu0  ;;  %v6387_v56 = vpop.f32.mrf.mxu1 }
  0xde   : > { %v6390_v57 = vpop.f32.mrf.mxu0  ;;  %v6392_v59 = vpop.f32.mrf.mxu1  ;;  %5489 = vmatmul.mubr.msk.f32.gmra.mxu1 %vm276_vm1, %v2725_v62  ;;  %5547 = vmatmul.mubr.msk.f32.gmra.mxu0 %vm276_vm1, %v2727_v49  ;;  %v2743_v62 = vld [vmem:[%s5779_s29 + $0x10c] sm:$0xff] }
  0xdf   : > { %5491 = vmatprep.mubr.msk.f32.mxu1 %vm276_vm1, %v2726_v4  ;;  %5549 = vmatprep.mubr.msk.f32.mxu0 %vm276_vm1, %v2728_v55 }
  0xe0   : > { %v6399_v10 = vpop.f32.mrf.mxu0  ;;  %v6401_v63 = vpop.f32.mrf.mxu1 }
  0xe2   : > { %v6404_v1 = vpop.f32.mrf.mxu0  ;;  %v6406_v3 = vpop.f32.mrf.mxu1  ;;  %5492 = vmatmul.mubr.msk.f32.gmra.mxu1 %vm276_vm1, %v2727_v49  ;;  %5550 = vmatmul.mubr.msk.f32.gmra.mxu0 %vm276_vm1, %v2729_v61 }
  0xe3   : > { %5494 = vmatprep.mubr.msk.f32.mxu1 %vm276_vm1, %v2728_v55  ;;  %5552 = vmatprep.mubr.msk.f32.mxu0 %vm276_vm1, %v2730_v12 }
  0xe4   : > { %v6413_v7 = vpop.f32.mrf.mxu0  ;;  %v6415_v9 = vpop.f32.mrf.mxu1 }
  0xe6   : > { %v6418_v13 = vpop.f32.mrf.mxu0  ;;  %v6420_v14 = vpop.f32.mrf.mxu1  ;;  %5495 = vmatmul.mubr.msk.f32.gmra.mxu1 %vm276_vm1, %v2729_v61  ;;  %5553 = vmatmul.mubr.msk.f32.gmra.mxu0 %vm276_vm1, %v2731_v5 }
  0xe7   : > { %5497 = vmatprep.mubr.msk.f32.mxu1 %vm276_vm1, %v2730_v12  ;;  %5555 = vmatprep.mubr.msk.f32.mxu0 %vm276_vm1, %v2732_v11 }
  0xe8   : > { %v6427_v16 = vpop.f32.mrf.mxu0  ;;  %v6429_v17 = vpop.f32.mrf.mxu1 }
  0xea   : > { %v6432_v19 = vpop.f32.mrf.mxu0  ;;  %v6434_v20 = vpop.f32.mrf.mxu1  ;;  %5498 = vmatmul.mubr.msk.f32.gmra.mxu1 %vm276_vm1, %v2731_v5  ;;  %5556 = vmatmul.mubr.msk.f32.gmra.mxu0 %vm276_vm1, %v2733_v15 }
  0xeb   : > { %5500 = vmatprep.mubr.msk.f32.mxu1 %vm276_vm1, %v2732_v11  ;;  %5558 = vmatprep.mubr.msk.f32.mxu0 %vm276_vm1, %v2734_v18 }
  0xec   : > { %v6441_v22 = vpop.f32.mrf.mxu0  ;;  %v6443_v23 = vpop.f32.mrf.mxu1 }
  0xee   : > { %v6446_v25 = vpop.f32.mrf.mxu0  ;;  %v6448_v26 = vpop.f32.mrf.mxu1  ;;  %5501 = vmatmul.mubr.msk.f32.gmra.mxu1 %vm276_vm1, %v2733_v15  ;;  %5559 = vmatmul.mubr.msk.f32.gmra.mxu0 %vm276_vm1, %v2735_v21  ;;  %v2745_v15 = vld [vmem:[%s5779_s29 + $0x11c] sm:$0xff] }
  0xef   : > { %5503 = vmatprep.mubr.msk.f32.mxu1 %vm276_vm1, %v2734_v18  ;;  %5561 = vmatprep.mubr.msk.f32.mxu0 %vm276_vm1, %v2736_v24 }
  0xf0   : > { %v6455_v28 = vpop.f32.mrf.mxu0  ;;  %v6457_v29 = vpop.f32.mrf.mxu1 }
  0xf2   : > { %v6460_v31 = vpop.f32.mrf.mxu0  ;;  %v6462_v32 = vpop.f32.mrf.mxu1  ;;  %5504 = vmatmul.mubr.msk.f32.gmra.mxu1 %vm276_vm1, %v2735_v21  ;;  %5562 = vmatmul.mubr.msk.f32.gmra.mxu0 %vm276_vm1, %v2737_v27 }
  0xf3   : > { %5506 = vmatprep.mubr.msk.f32.mxu1 %vm276_vm1, %v2736_v24  ;;  %5564 = vmatprep.mubr.msk.f32.mxu0 %vm276_vm1, %v2738_v30 }
  0xf4   : > { %v6469_v34 = vpop.f32.mrf.mxu0  ;;  %v6471_v35 = vpop.f32.mrf.mxu1 }
  0xf6   : > { %v5240_v37 = vpop.f32.mrf.mxu1  ;;  %v5298_v38 = vpop.f32.mrf.mxu0  ;;  %5507 = vmatmul.mubr.msk.f32.gmra.mxu1 %vm276_vm1, %v2737_v27  ;;  %5565 = vmatmul.mubr.msk.f32.gmra.mxu0 %vm276_vm1, %v2739_v33 }
  0xf7   : > { %v817_v39 = vadd.f32 %v5240_v37, %v6348_v47  ;;  %5509 = vmatprep.mubr.msk.f32.mxu1 %vm276_vm1, %v2738_v30  ;;  %5567 = vmatprep.mubr.msk.f32.mxu0 %vm276_vm1, %v2740_v36  ;;  %v2747_v37 = vld [vmem:[%s5779_s29 + $0x12c] sm:$0xff] }
  0xf8   : > { %v811_v41 = vpop.f32.mrf.mxu1  ;;  %v1206_v42 = vpop.f32.mrf.mxu0 }
  0xf9   : > { %v6481_v44 = vadd.f32 %v5298_v38, %v817_v39  ;;  %v812_v45 = vadd.f32 %v811_v41, %v6357_v51  ;;  %v2744_v51 = vld [vmem:[%s5779_s29 + $0x114] sm:$0xff] }
  0xfa   : > { %v5243_v46 = vpop.f32.mrf.mxu1  ;;  %v5301_v50 = vpop.f32.mrf.mxu0  ;;  %5510 = vmatmul.mubr.msk.f32.gmra.mxu1 %vm276_vm1, %v2739_v33  ;;  %5568 = vmatmul.mubr.msk.f32.gmra.mxu0 %vm276_vm1, %v2741_v40 }
  0xfb   : > { %v6486_v47 = vadd.f32 %v1206_v42, %v812_v45  ;;  %v827_v54 = vadd.f32 %v5243_v46, %v6362_v58  ;;  %5512 = vmatprep.mubr.msk.f32.mxu1 %vm276_vm1, %v2740_v36  ;;  %5570 = vmatprep.mubr.msk.f32.mxu0 %vm276_vm1, %v2742_v43  ;;  %v2749_v46 = vld [vmem:[%s5779_s29 + $0x13c] sm:$0xff] }
  0xfc   : > { %v821_v4 = vpop.f32.mrf.mxu1  ;;  %v1216_v49 = vpop.f32.mrf.mxu0 }
  0xfd   : > { %v6493_v55 = vadd.f32 %v5301_v50, %v827_v54  ;;  %v822_v61 = vadd.f32 %v821_v4, %v6371_v0  ;;  %v2746_v0 = vld [vmem:[%s5779_s29 + $0x124] sm:$0xff] }
  0xfe   : > { %v5246_v12 = vpop.f32.mrf.mxu1  ;;  %v5304_v5 = vpop.f32.mrf.mxu0  ;;  %5513 = vmatmul.mubr.msk.f32.gmra.mxu1 %vm276_vm1, %v2741_v40  ;;  %5571 = vmatmul.mubr.msk.f32.gmra.mxu0 %vm276_vm1, %v2743_v62 }
  0xff   : > { %v6498_v58 = vadd.f32 %v1216_v49, %v822_v61  ;;  %v837_v11 = vadd.f32 %v5246_v12, %v6376_v6  ;;  %5515 = vmatprep.mubr.msk.f32.mxu1 %vm276_vm1, %v2742_v43  ;;  %5573 = vmatprep.mubr.msk.f32.mxu0 %vm276_vm1, %v2744_v51 }
 0x100   : > { %v831_v18 = vpop.f32.mrf.mxu1  ;;  %v1226_v21 = vpop.f32.mrf.mxu0 }
 0x101   : > { %v6505_v24 = vadd.f32 %v5304_v5, %v837_v11  ;;  %v832_v27 = vadd.f32 %v831_v18, %v6385_v53  ;;  %v2748_v53 = vld [vmem:[%s5779_s29 + $0x134] sm:$0xff] }
 0x102   : > { %v5249_v30 = vpop.f32.mrf.mxu1  ;;  %v5307_v33 = vpop.f32.mrf.mxu0  ;;  %5516 = vmatmul.mubr.msk.f32.gmra.mxu1 %vm276_vm1, %v2743_v62  ;;  %5574 = vmatmul.mubr.msk.f32.gmra.mxu0 %vm276_vm1, %v2745_v15  ;;  %v3576_v62 = vld [vmem:[%s5779_s29 + $0x26] sm:$0xff]  ;;  %v3577_v11 = vld [vmem:[%s5779_s29 + $0x2e] sm:$0xff] }
 0x103   : > { %v6510_v6 = vadd.f32 %v1226_v21, %v832_v27  ;;  %v847_v36 = vadd.f32 %v5249_v30, %v6390_v57  ;;  %5518 = vmatprep.mubr.msk.f32.mxu1 %vm276_vm1, %v2744_v51  ;;  %5576 = vmatprep.mubr.msk.f32.mxu0 %vm276_vm1, %v2746_v0  ;;  %v3146_v5 = vld [vmem:[%s5779_s29 + $0x2d] sm:$0xff]  ;;  %v3147_v18 = vld [vmem:[%s5779_s29 + $0x35] sm:$0xff] }
 0x104   : > { %v841_v38 = vpop.f32.mrf.mxu1  ;;  %v1236_v39 = vpop.f32.mrf.mxu0  ;;  %v3578_v21 = vld [vmem:[%s5779_s29 + $0x36] sm:$0xff] }
 0x105   : > { %v6517_v40 = vadd.f32 %v5307_v33, %v847_v36  ;;  %v842_v41 = vadd.f32 %v841_v38, %v6399_v10  ;;  %v3145_v10 = vld [vmem:[%s5779_s29 + $0x25] sm:$0xff] }
 0x106   : > { %v5252_v42 = vpop.f32.mrf.mxu1  ;;  %v5310_v43 = vpop.f32.mrf.mxu0  ;;  %5519 = vmatmul.mubr.msk.f32.gmra.mxu1 %vm276_vm1, %v2745_v15  ;;  %5577 = vmatmul.mubr.msk.f32.gmra.mxu0 %vm276_vm1, %v2747_v37  ;;  %v3579_v38 = vld [vmem:[%s5779_s29 + $0x3e] sm:$0xff] }
 0x107   : > { %v6522_v57 = vadd.f32 %v1236_v39, %v842_v41  ;;  %v857_v45 = vadd.f32 %v5252_v42, %v6404_v1  ;;  %5521 = vmatprep.mubr.msk.f32.mxu1 %vm276_vm1, %v2746_v0  ;;  %5579 = vmatprep.mubr.msk.f32.mxu0 %vm276_vm1, %v2748_v53  ;;  %v3149_v53 = vld [vmem:[%s5779_s29 + $0x45] sm:$0xff] }
 0x108   : > { %v851_v50 = vpop.f32.mrf.mxu1  ;;  %v1246_v54 = vpop.f32.mrf.mxu0  ;;  %v3580_v41 = vld [vmem:[%s5779_s29 + $0x46] sm:$0xff] }
 0x109   : > { %v6530_v4 = vadd.f32 %v5310_v43, %v857_v45  ;;  %v852_v49 = vadd.f32 %v851_v50, %v6413_v7 }
 0x10a   : > { %v5255_v51 = vpop.f32.mrf.mxu1  ;;  %v5313_v61 = vpop.f32.mrf.mxu0  ;;  %5522 = vmatmul.mubr.msk.f32.gmra.mxu1 %vm276_vm1, %v2747_v37  ;;  %5580 = vmatmul.mubr.msk.f32.gmra.mxu0 %vm276_vm1, %v2749_v46  ;;  %v3148_v37 = vld [vmem:[%s5779_s29 + $0x3d] sm:$0xff] }
 0x10b   : > { %v6535_v1 = vadd.f32 %v1246_v54, %v852_v49  ;;  %v867_v12 = vadd.f32 %v5255_v51, %v6418_v13  ;;  %5586 = vmatprep.mubr.msk.f32.mxu1 %vm276_vm1, %v3145_v10  ;;  %5644 = vmatprep.mubr.msk.f32.mxu0 %vm276_vm1, %v3576_v62  ;;  %v3150_v54 = vld [vmem:[%s5779_s29 + $0x4d] sm:$0xff]  ;;  %v3151_v49 = vld [vmem:[%s5779_s29 + $0x55] sm:$0xff] }
 0x10c   : > { %v861_v15 = vpop.f32.mrf.mxu1  ;;  %v1256_v7 = vpop.f32.mrf.mxu0  ;;  %v3581_v10 = vld [vmem:[%s5779_s29 + $0x4e] sm:$0xff]  ;;  %v3582_v51 = vld [vmem:[%s5779_s29 + $0x56] sm:$0xff] }
 0x10d   : > { %v6544_v0 = vadd.f32 %v5313_v61, %v867_v12  ;;  %v862_v27 = vadd.f32 %v861_v15, %v6427_v16 }
 0x10e   : > { %v5258_v30 = vpop.f32.mrf.mxu1  ;;  %v5316_v13 = vpop.f32.mrf.mxu0  ;;  %5587 = vmatmul.mubr.msk.f32.vlgmr.msra.gmra.mxu1 %vm276_vm1, %v3146_v5  ;;  %5645 = vmatmul.mubr.msk.f32.vlgmr.msra.gmra.mxu0 %vm276_vm1, %v3577_v11 }
 0x10f   : > { %v6549_v33 = vadd.f32 %v1256_v7, %v862_v27  ;;  %v877_v36 = vadd.f32 %v5258_v30, %v6432_v19  ;;  %5589 = vmatprep.mubr.msk.f32.mxu1 %vm276_vm1, %v3147_v18  ;;  %5647 = vmatprep.mubr.msk.f32.mxu0 %vm276_vm1, %v3578_v21  ;;  %v3152_v7 = vld [vmem:[%s5779_s29 + $0x5d] sm:$0xff]  ;;  %v3153_v27 = vld [vmem:[%s5779_s29 + $0x65] sm:$0xff] }
 0x110   : > { %v871_v39 = vpop.f32.mrf.mxu1  ;;  %v1266_v16 = vpop.f32.mrf.mxu0  ;;  %v3583_v18 = vld [vmem:[%s5779_s29 + $0x5e] sm:$0xff]  ;;  %v3584_v30 = vld [vmem:[%s5779_s29 + $0x66] sm:$0xff] }
 0x111   : > { %v6558_v42 = vadd.f32 %v5316_v13, %v877_v36  ;;  %v872_v43 = vadd.f32 %v871_v39, %v6441_v22 }
 0x112   : > { %v5261_v45 = vpop.f32.mrf.mxu1  ;;  %v5319_v19 = vpop.f32.mrf.mxu0  ;;  %5590 = vmatmul.mubr.msk.f32.gmra.mxu1 %vm276_vm1, %v3148_v37  ;;  %5648 = vmatmul.mubr.msk.f32.gmra.mxu0 %vm276_vm1, %v3579_v38 }
 0x113   : > { %v6563_v46 = vadd.f32 %v1266_v16, %v872_v43  ;;  %v887_v50 = vadd.f32 %v5261_v45, %v6446_v25  ;;  %5592 = vmatprep.mubr.msk.f32.mxu1 %vm276_vm1, %v3149_v53  ;;  %5650 = vmatprep.mubr.msk.f32.mxu0 %vm276_vm1, %v3580_v41  ;;  %v3154_v16 = vld [vmem:[%s5779_s29 + $0x6d] sm:$0xff]  ;;  %v3155_v43 = vld [vmem:[%s5779_s29 + $0x75] sm:$0xff] }
 0x114   : > { %v881_v62 = vpop.f32.mrf.mxu1  ;;  %v1276_v22 = vpop.f32.mrf.mxu0  ;;  %v3585_v53 = vld [vmem:[%s5779_s29 + $0x6e] sm:$0xff]  ;;  %v3586_v45 = vld [vmem:[%s5779_s29 + $0x76] sm:$0xff] }
 0x115   : > { %v6572_v61 = vadd.f32 %v5319_v19, %v887_v50  ;;  %v882_v12 = vadd.f32 %v881_v62, %v6455_v28 }
 0x116   : > { %v5264_v5 = vpop.f32.mrf.mxu1  ;;  %v5322_v25 = vpop.f32.mrf.mxu0  ;;  %5593 = vmatmul.mubr.msk.f32.gmra.mxu1 %vm276_vm1, %v3150_v54  ;;  %5651 = vmatmul.mubr.msk.f32.gmra.mxu0 %vm276_vm1, %v3581_v10 }
 0x117   : > { %v6577_v11 = vadd.f32 %v1276_v22, %v882_v12  ;;  %v897_v15 = vadd.f32 %v5264_v5, %v6460_v31  ;;  %5595 = vmatprep.mubr.msk.f32.mxu1 %vm276_vm1, %v3151_v49  ;;  %5653 = vmatprep.mubr.msk.f32.mxu0 %vm276_vm1, %v3582_v51  ;;  %v3156_v22 = vld [vmem:[%s5779_s29 + $0x7d] sm:$0xff]  ;;  %v3157_v12 = vld [vmem:[%s5779_s29 + $0x85] sm:$0xff] }
 0x118   : > { %v891_v21 = vpop.f32.mrf.mxu1  ;;  %v1286_v28 = vpop.f32.mrf.mxu0  ;;  %v3587_v49 = vld [vmem:[%s5779_s29 + $0x7e] sm:$0xff]  ;;  %v3588_v5 = vld [vmem:[%s5779_s29 + $0x86] sm:$0xff] }
 0x119   : > { %v6586_v13 = vadd.f32 %v5322_v25, %v897_v15  ;;  %v892_v36 = vadd.f32 %v891_v21, %v6469_v34 }
 0x11a   : > { %v5267_v37 = vpop.f32.mrf.mxu1  ;;  %v5325_v31 = vpop.f32.mrf.mxu0  ;;  %5596 = vmatmul.mubr.msk.f32.gmra.mxu1 %vm276_vm1, %v3152_v7  ;;  %5654 = vmatmul.mubr.msk.f32.gmra.mxu0 %vm276_vm1, %v3583_v18 }
 0x11b   : > { %v6591_v38 = vadd.f32 %v1286_v28, %v892_v36  ;;  %v907_v39 = vadd.f32 %v5267_v37, %v6350_v48  ;;  %5598 = vmatprep.mubr.msk.f32.mxu1 %vm276_vm1, %v3153_v27  ;;  %5656 = vmatprep.mubr.msk.f32.mxu0 %vm276_vm1, %v3584_v30  ;;  %v3158_v28 = vld [vmem:[%s5779_s29 + $0x8d] sm:$0xff]  ;;  %v3159_v36 = vld [vmem:[%s5779_s29 + $0x95] sm:$0xff] }
 0x11c   : > { %v901_v41 = vpop.f32.mrf.mxu1  ;;  %v1296_v34 = vpop.f32.mrf.mxu0  ;;  %v3589_v27 = vld [vmem:[%s5779_s29 + $0x8e] sm:$0xff]  ;;  %v3590_v37 = vld [vmem:[%s5779_s29 + $0x96] sm:$0xff] }
 0x11d   : > { %v6600_v19 = vadd.f32 %v5325_v31, %v907_v39  ;;  %v902_v50 = vadd.f32 %v901_v41, %v6359_v52 }
 0x11e   : > { %v5270_v54 = vpop.f32.mrf.mxu1  ;;  %v5328_v48 = vpop.f32.mrf.mxu0  ;;  %5599 = vmatmul.mubr.msk.f32.gmra.mxu1 %vm276_vm1, %v3154_v16  ;;  %5657 = vmatmul.mubr.msk.f32.gmra.mxu0 %vm276_vm1, %v3585_v53 }
 0x11f   : > { %v6605_v10 = vadd.f32 %v1296_v34, %v902_v50  ;;  %v917_v62 = vadd.f32 %v5270_v54, %v6364_v60  ;;  %5601 = vmatprep.mubr.msk.f32.mxu1 %vm276_vm1, %v3155_v43  ;;  %5659 = vmatprep.mubr.msk.f32.mxu0 %vm276_vm1, %v3586_v45  ;;  %v3160_v34 = vld [vmem:[%s5779_s29 + $0x9d] sm:$0xff]  ;;  %v3161_v50 = vld [vmem:[%s5779_s29 + $0xa5] sm:$0xff] }
 0x120   : > { %v911_v51 = vpop.f32.mrf.mxu1  ;;  %v1306_v52 = vpop.f32.mrf.mxu0  ;;  %v3591_v43 = vld [vmem:[%s5779_s29 + $0x9e] sm:$0xff]  ;;  %v3592_v54 = vld [vmem:[%s5779_s29 + $0xa6] sm:$0xff] }
 0x121   : > { %v6614_v25 = vadd.f32 %v5328_v48, %v917_v62  ;;  %v912_v15 = vadd.f32 %v911_v51, %v6373_v2 }
 0x122   : > { %v5273_v7 = vpop.f32.mrf.mxu1  ;;  %v5331_v60 = vpop.f32.mrf.mxu0  ;;  %5602 = vmatmul.mubr.msk.f32.gmra.mxu1 %vm276_vm1, %v3156_v22  ;;  %5660 = vmatmul.mubr.msk.f32.gmra.mxu0 %vm276_vm1, %v3587_v49 }
 0x123   : > { %v6619_v18 = vadd.f32 %v1306_v52, %v912_v15  ;;  %v927_v21 = vadd.f32 %v5273_v7, %v6378_v8  ;;  %5604 = vmatprep.mubr.msk.f32.mxu1 %vm276_vm1, %v3157_v12  ;;  %5662 = vmatprep.mubr.msk.f32.mxu0 %vm276_vm1, %v3588_v5  ;;  %v3162_v52 = vld [vmem:[%s5779_s29 + $0xad] sm:$0xff]  ;;  %v3163_v15 = vld [vmem:[%s5779_s29 + $0xb5] sm:$0xff] }
 0x124   : > { %v921_v30 = vpop.f32.mrf.mxu1  ;;  %v1316_v2 = vpop.f32.mrf.mxu0  ;;  %v3593_v12 = vld [vmem:[%s5779_s29 + $0xae] sm:$0xff]  ;;  %v3594_v7 = vld [vmem:[%s5779_s29 + $0xb6] sm:$0xff] }
 0x125   : > { %v6628_v31 = vadd.f32 %v5331_v60, %v927_v21  ;;  %v922_v39 = vadd.f32 %v921_v30, %v6387_v56 }
 0x126   : > { %v5276_v16 = vpop.f32.mrf.mxu1  ;;  %v5334_v8 = vpop.f32.mrf.mxu0  ;;  %5605 = vmatmul.mubr.msk.f32.gmra.mxu1 %vm276_vm1, %v3158_v28  ;;  %5663 = vmatmul.mubr.msk.f32.gmra.mxu0 %vm276_vm1, %v3589_v27 }
 0x127   : > { %v6633_v53 = vadd.f32 %v1316_v2, %v922_v39  ;;  %v937_v41 = vadd.f32 %v5276_v16, %v6392_v59  ;;  %5607 = vmatprep.mubr.msk.f32.mxu1 %vm276_vm1, %v3159_v36  ;;  %5665 = vmatprep.mubr.msk.f32.mxu0 %vm276_vm1, %v3590_v37  ;;  %v3164_v2 = vld [vmem:[%s5779_s29 + $0xbd] sm:$0xff]  ;;  %v3165_v39 = vld [vmem:[%s5779_s29 + $0xc5] sm:$0xff] }
 0x128   : > { %v931_v45 = vpop.f32.mrf.mxu1  ;;  %v1326_v56 = vpop.f32.mrf.mxu0  ;;  %v3595_v36 = vld [vmem:[%s5779_s29 + $0xbe] sm:$0xff]  ;;  %v3596_v16 = vld [vmem:[%s5779_s29 + $0xc6] sm:$0xff] }
 0x129   : > { %v6642_v48 = vadd.f32 %v5334_v8, %v937_v41  ;;  %v932_v62 = vadd.f32 %v931_v45, %v6401_v63 }
 0x12a   : > { %v5279_v22 = vpop.f32.mrf.mxu1  ;;  %v5337_v59 = vpop.f32.mrf.mxu0  ;;  %5608 = vmatmul.mubr.msk.f32.gmra.mxu1 %vm276_vm1, %v3160_v34  ;;  %5666 = vmatmul.mubr.msk.f32.gmra.mxu0 %vm276_vm1, %v3591_v43 }
 0x12b   : > { %v6647_v49 = vadd.f32 %v1326_v56, %v932_v62  ;;  %v947_v51 = vadd.f32 %v5279_v22, %v6406_v3  ;;  %5610 = vmatprep.mubr.msk.f32.mxu1 %vm276_vm1, %v3161_v50  ;;  %5668 = vmatprep.mubr.msk.f32.mxu0 %vm276_vm1, %v3592_v54  ;;  %v3166_v56 = vld [vmem:[%s5779_s29 + $0xcd] sm:$0xff]  ;;  %v3167_v62 = vld [vmem:[%s5779_s29 + $0xd5] sm:$0xff] }
 0x12c   : > { %v941_v5 = vpop.f32.mrf.mxu1  ;;  %v1336_v63 = vpop.f32.mrf.mxu0  ;;  %v3597_v50 = vld [vmem:[%s5779_s29 + $0xce] sm:$0xff]  ;;  %v3598_v22 = vld [vmem:[%s5779_s29 + $0xd6] sm:$0xff] }
 0x12d   : > { %v6656_v60 = vadd.f32 %v5337_v59, %v947_v51  ;;  %v942_v21 = vadd.f32 %v941_v5, %v6415_v9 }
 0x12e   : > { %v5282_v28 = vpop.f32.mrf.mxu1  ;;  %v5340_v3 = vpop.f32.mrf.mxu0  ;;  %5611 = vmatmul.mubr.msk.f32.gmra.mxu1 %vm276_vm1, %v3162_v52  ;;  %5669 = vmatmul.mubr.msk.f32.gmra.mxu0 %vm276_vm1, %v3593_v12 }
 0x12f   : > { %v6661_v27 = vadd.f32 %v1336_v63, %v942_v21  ;;  %v957_v30 = vadd.f32 %v5282_v28, %v6420_v14  ;;  %5613 = vmatprep.mubr.msk.f32.mxu1 %vm276_vm1, %v3163_v15  ;;  %5671 = vmatprep.mubr.msk.f32.mxu0 %vm276_vm1, %v3594_v7  ;;  %v3168_v63 = vld [vmem:[%s5779_s29 + $0xdd] sm:$0xff]  ;;  %v3169_v21 = vld [vmem:[%s5779_s29 + $0xe5] sm:$0xff] }
 0x130   : > { %v951_v37 = vpop.f32.mrf.mxu1  ;;  %v1346_v9 = vpop.f32.mrf.mxu0  ;;  %v3599_v15 = vld [vmem:[%s5779_s29 + $0xde] sm:$0xff]  ;;  %v3600_v28 = vld [vmem:[%s5779_s29 + $0xe6] sm:$0xff] }
 0x131   : > { %v6670_v8 = vadd.f32 %v5340_v3, %v957_v30  ;;  %v952_v41 = vadd.f32 %v951_v37, %v6429_v17 }
 0x132   : > { %v5285_v34 = vpop.f32.mrf.mxu1  ;;  %v5343_v14 = vpop.f32.mrf.mxu0  ;;  %5614 = vmatmul.mubr.msk.f32.gmra.mxu1 %vm276_vm1, %v3164_v2  ;;  %5672 = vmatmul.mubr.msk.f32.gmra.mxu0 %vm276_vm1, %v3595_v36 }
 0x133   : > { %v6675_v43 = vadd.f32 %v1346_v9, %v952_v41  ;;  %v967_v45 = vadd.f32 %v5285_v34, %v6434_v20  ;;  %5616 = vmatprep.mubr.msk.f32.mxu1 %vm276_vm1, %v3165_v39  ;;  %5674 = vmatprep.mubr.msk.f32.mxu0 %vm276_vm1, %v3596_v16  ;;  %v3170_v9 = vld [vmem:[%s5779_s29 + $0xed] sm:$0xff]  ;;  %v3171_v41 = vld [vmem:[%s5779_s29 + $0xf5] sm:$0xff] }
 0x134   : > { %v961_v54 = vpop.f32.mrf.mxu1  ;;  %v1356_v17 = vpop.f32.mrf.mxu0  ;;  %v3601_v39 = vld [vmem:[%s5779_s29 + $0xee] sm:$0xff]  ;;  %v3602_v34 = vld [vmem:[%s5779_s29 + $0xf6] sm:$0xff] }
 0x135   : > { %v6684_v59 = vadd.f32 %v5343_v14, %v967_v45  ;;  %v962_v51 = vadd.f32 %v961_v54, %v6443_v23 }
 0x136   : > { %v5288_v52 = vpop.f32.mrf.mxu1  ;;  %v5346_v20 = vpop.f32.mrf.mxu0  ;;  %5617 = vmatmul.mubr.msk.f32.gmra.mxu1 %vm276_vm1, %v3166_v56  ;;  %5675 = vmatmul.mubr.msk.f32.gmra.mxu0 %vm276_vm1, %v3597_v50 }
 0x137   : > { %v6689_v12 = vadd.f32 %v1356_v17, %v962_v51  ;;  %v977_v5 = vadd.f32 %v5288_v52, %v6448_v26  ;;  %5619 = vmatprep.mubr.msk.f32.mxu1 %vm276_vm1, %v3167_v62  ;;  %5677 = vmatprep.mubr.msk.f32.mxu0 %vm276_vm1, %v3598_v22  ;;  %v3172_v17 = vld [vmem:[%s5779_s29 + $0xfd] sm:$0xff]  ;;  %v3173_v51 = vld [vmem:[%s5779_s29 + $0x105] sm:$0xff] }
 0x138   : > { %v971_v7 = vpop.f32.mrf.mxu1  ;;  %v1366_v23 = vpop.f32.mrf.mxu0  ;;  %v3603_v62 = vld [vmem:[%s5779_s29 + $0xfe] sm:$0xff]  ;;  %v3604_v52 = vld [vmem:[%s5779_s29 + $0x106] sm:$0xff] }
 0x139   : > { %v6698_v3 = vadd.f32 %v5346_v20, %v977_v5  ;;  %v972_v30 = vadd.f32 %v971_v7, %v6457_v29 }
 0x13a   : > { %v5291_v2 = vpop.f32.mrf.mxu1  ;;  %v5349_v26 = vpop.f32.mrf.mxu0  ;;  %5620 = vmatmul.mubr.msk.f32.gmra.mxu1 %vm276_vm1, %v3168_v63  ;;  %5678 = vmatmul.mubr.msk.f32.gmra.mxu0 %vm276_vm1, %v3599_v15 }
 0x13b   : > { %v6703_v36 = vadd.f32 %v1366_v23, %v972_v30  ;;  %v987_v37 = vadd.f32 %v5291_v2, %v6462_v32  ;;  %5622 = vmatprep.mubr.msk.f32.mxu1 %vm276_vm1, %v3169_v21  ;;  %5680 = vmatprep.mubr.msk.f32.mxu0 %vm276_vm1, %v3600_v28  ;;  %v3174_v23 = vld [vmem:[%s5779_s29 + $0x10d] sm:$0xff]  ;;  %v3175_v30 = vld [vmem:[%s5779_s29 + $0x115] sm:$0xff] }
 0x13c   : > { %v981_v16 = vpop.f32.mrf.mxu1  ;;  %v1376_v29 = vpop.f32.mrf.mxu0  ;;  %v3605_v21 = vld [vmem:[%s5779_s29 + $0x10e] sm:$0xff]  ;;  %v3606_v2 = vld [vmem:[%s5779_s29 + $0x116] sm:$0xff] }
 0x13d   : > { %v6712_v14 = vadd.f32 %v5349_v26, %v987_v37  ;;  %v982_v45 = vadd.f32 %v981_v16, %v6471_v35 }
 0x13e   : > { %v5356_v56 = vpop.f32.mrf.mxu1  ;;  %v5414_v32 = vpop.f32.mrf.mxu0  ;;  %5623 = vmatmul.mubr.msk.f32.gmra.mxu1 %vm276_vm1, %v3170_v9  ;;  %5681 = vmatmul.mubr.msk.f32.gmra.mxu0 %vm276_vm1, %v3601_v39 }
 0x13f   : > { %v6717_v50 = vadd.f32 %v1376_v29, %v982_v45  ;;  %v1817_v54 = vadd.f32 %v5356_v56, %v6481_v44  ;;  %5625 = vmatprep.mubr.msk.f32.mxu1 %vm276_vm1, %v3171_v41  ;;  %5683 = vmatprep.mubr.msk.f32.mxu0 %vm276_vm1, %v3602_v34  ;;  %v3176_v29 = vld [vmem:[%s5779_s29 + $0x11d] sm:$0xff]  ;;  %v3177_v45 = vld [vmem:[%s5779_s29 + $0x125] sm:$0xff] }
 0x140   : > { %v1637_v22 = vpop.f32.mrf.mxu1  ;;  %v2068_v35 = vpop.f32.mrf.mxu0  ;;  %v3607_v41 = vld [vmem:[%s5779_s29 + $0x11e] sm:$0xff]  ;;  %v3608_v56 = vld [vmem:[%s5779_s29 + $0x126] sm:$0xff] }
 0x141   : > { %v6726_v20 = vadd.f32 %v5414_v32, %v1817_v54  ;;  %v1816_v5 = vadd.f32 %v1637_v22, %v6486_v47 }
 0x142   : > { %v5359_v63 = vpop.f32.mrf.mxu1  ;;  %v5417_v44 = vpop.f32.mrf.mxu0  ;;  %5626 = vmatmul.mubr.msk.f32.gmra.mxu1 %vm276_vm1, %v3172_v17  ;;  %5684 = vmatmul.mubr.msk.f32.gmra.mxu0 %vm276_vm1, %v3603_v62 }
 0x143   : > { %v6731_v15 = vadd.f32 %v2068_v35, %v1816_v5  ;;  %v1819_v7 = vadd.f32 %v5359_v63, %v6493_v55  ;;  %5628 = vmatprep.mubr.msk.f32.mxu1 %vm276_vm1, %v3173_v51  ;;  %5686 = vmatprep.mubr.msk.f32.mxu0 %vm276_vm1, %v3604_v52  ;;  %v3178_v35 = vld [vmem:[%s5779_s29 + $0x12d] sm:$0xff]  ;;  %v3179_v5 = vld [vmem:[%s5779_s29 + $0x135] sm:$0xff] }
 0x144   : > { %v1647_v28 = vpop.f32.mrf.mxu1  ;;  %v2078_v47 = vpop.f32.mrf.mxu0  ;;  %v3609_v51 = vld [vmem:[%s5779_s29 + $0x12e] sm:$0xff]  ;;  %v3610_v63 = vld [vmem:[%s5779_s29 + $0x136] sm:$0xff] }
 0x145   : > { %v6740_v26 = vadd.f32 %v5417_v44, %v1819_v7  ;;  %v1818_v37 = vadd.f32 %v1647_v28, %v6498_v58 }
 0x146   : > { %v5362_v9 = vpop.f32.mrf.mxu1  ;;  %v5420_v55 = vpop.f32.mrf.mxu0  ;;  %5629 = vmatmul.mubr.msk.f32.gmra.mxu1 %vm276_vm1, %v3174_v23  ;;  %5687 = vmatmul.mubr.msk.f32.gmra.mxu0 %vm276_vm1, %v3605_v21 }
 0x147   : > { %v6745_v39 = vadd.f32 %v2078_v47, %v1818_v37  ;;  %v1821_v16 = vadd.f32 %v5362_v9, %v6505_v24  ;;  %5631 = vmatprep.mubr.msk.f32.mxu1 %vm276_vm1, %v3175_v30  ;;  %5689 = vmatprep.mubr.msk.f32.mxu0 %vm276_vm1, %v3606_v2  ;;  %v3180_v47 = vld [vmem:[%s5779_s29 + $0x13d] sm:$0xff] }
 0x148   : > { %v1657_v34 = vpop.f32.mrf.mxu1  ;;  %v2088_v58 = vpop.f32.mrf.mxu0  ;;  %v3611_v30 = vld [vmem:[%s5779_s29 + $0x13e] sm:$0xff]  ;;  %s5720_s29 = smov 112  }
 0x149   : > { %v6754_v32 = vadd.f32 %v5420_v55, %v1821_v16  ;;  %v1820_v54 = vadd.f32 %v1657_v34, %v6510_v6 }
 0x14a   : > { %v5365_v17 = vpop.f32.mrf.mxu1  ;;  %v5423_v24 = vpop.f32.mrf.mxu0  ;;  %5632 = vmatmul.mubr.msk.f32.gmra.mxu1 %vm276_vm1, %v3176_v29  ;;  %5690 = vmatmul.mubr.msk.f32.gmra.mxu0 %vm276_vm1, %v3607_v41 }
 0x14b   : > { %v6759_v62 = vadd.f32 %v2088_v58, %v1820_v54  ;;  %v1823_v22 = vadd.f32 %v5365_v17, %v6517_v40  ;;  %5634 = vmatprep.mubr.msk.f32.mxu1 %vm276_vm1, %v3177_v45  ;;  %5692 = vmatprep.mubr.msk.f32.mxu0 %vm276_vm1, %v3608_v56 }
 0x14c   : > { %v1667_v52 = vpop.f32.mrf.mxu1  ;;  %v2098_v6 = vpop.f32.mrf.mxu0 }
 0x14d   : > { %v6768_v44 = vadd.f32 %v5423_v24, %v1823_v22  ;;  %v1822_v7 = vadd.f32 %v1667_v52, %v6522_v57 }
 0x14e   : > { %v5368_v23 = vpop.f32.mrf.mxu1  ;;  %v5426_v21 = vpop.f32.mrf.mxu0  ;;  %5635 = vmatmul.mubr.msk.f32.gmra.mxu1 %vm276_vm1, %v3178_v35  ;;  %5693 = vmatmul.mubr.msk.f32.gmra.mxu0 %vm276_vm1, %v3609_v51 }
 0x14f   : > { %v6773_v40 = vadd.f32 %v2098_v6, %v1822_v7  ;;  %v1825_v28 = vadd.f32 %v5368_v23, %v6530_v4  ;;  %5637 = vmatprep.mubr.msk.f32.mxu1 %vm276_vm1, %v3179_v5  ;;  %5695 = vmatprep.mubr.msk.f32.mxu0 %vm276_vm1, %v3610_v63 }
 0x150   : > { %v1677_v2 = vpop.f32.mrf.mxu1  ;;  %v2108_v37 = vpop.f32.mrf.mxu0 }
 0x151   : > { %v6780_v9 = vadd.f32 %v5426_v21, %v1825_v28  ;;  %v1824_v57 = vadd.f32 %v1677_v2, %v6535_v1 }
 0x152   : > { %v5371_v55 = vpop.f32.mrf.mxu1  ;;  %v5429_v16 = vpop.f32.mrf.mxu0  ;;  %5638 = vmatmul.mubr.msk.f32.gmra.mxu1 %vm276_vm1, %v3180_v47  ;;  %5696 = vmatmul.mubr.msk.f32.gmra.mxu0 %vm276_vm1, %v3611_v30 }
 0x153   : > { %v6785_v29 = vadd.f32 %v2108_v37, %v1824_v57  ;;  %v1827_v4 = vadd.f32 %v5371_v55, %v6544_v0 }
 0x154   : > { %v1687_v41 = vpop.f32.mrf.mxu1  ;;  %v2118_v34 = vpop.f32.mrf.mxu0 }
 0x155   : > { %v6788_v58 = vadd.f32 %v5429_v16, %v1827_v4  ;;  %v1826_v45 = vadd.f32 %v1687_v41, %v6549_v33 }
 0x156   : > { %v5374_v56 = vpop.f32.mrf.mxu1  ;;  %v5432_v54 = vpop.f32.mrf.mxu0 }
 0x157   : > { %v6791_v17 = vadd.f32 %v2118_v34, %v1826_v45  ;;  %v1829_v1 = vadd.f32 %v5374_v56, %v6558_v42 }
 0x158   : > { %v1697_v24 = vpop.f32.mrf.mxu1  ;;  %v2128_v22 = vpop.f32.mrf.mxu0 }
 0x159   : > { %v6794_v35 = vadd.f32 %v5432_v54, %v1829_v1  ;;  %v1828_v51 = vadd.f32 %v1697_v24, %v6563_v46 }
 0x15a   : > { %v5377_v52 = vpop.f32.mrf.mxu1  ;;  %v5435_v0 = vpop.f32.mrf.mxu0 }
 0x15b   : > { %v6797_v6 = vadd.f32 %v2128_v22, %v1828_v51  ;;  %v1831_v5 = vadd.f32 %v5377_v52, %v6572_v61 }
 0x15c   : > { %v1707_v63 = vpop.f32.mrf.mxu1  ;;  %v2138_v33 = vpop.f32.mrf.mxu0 }
 0x15d   : > { %v6800_v7 = vadd.f32 %v5435_v0, %v1831_v5  ;;  %v1830_v23 = vadd.f32 %v1707_v63, %v6577_v11 }
 0x15e   : > { %v5380_v21 = vpop.f32.mrf.mxu1  ;;  %v5438_v42 = vpop.f32.mrf.mxu0 }
 0x15f   : > { %v6803_v28 = vadd.f32 %v2138_v33, %v1830_v23  ;;  %v1833_v47 = vadd.f32 %v5380_v21, %v6586_v13 }
 0x160   : > { %v1717_v30 = vpop.f32.mrf.mxu1  ;;  %v2148_v46 = vpop.f32.mrf.mxu0 }
 0x161   : > { %v6806_v2 = vadd.f32 %v5438_v42, %v1833_v47  ;;  %v1832_v37 = vadd.f32 %v1717_v30, %v6591_v38 }
 0x162   : > { %v5383_v57 = vpop.f32.mrf.mxu1  ;;  %v5441_v61 = vpop.f32.mrf.mxu0 }
 0x163   : > { %v6809_v55 = vadd.f32 %v2148_v46, %v1832_v37  ;;  %v1835_v16 = vadd.f32 %v5383_v57, %v6600_v19 }
 0x164   : > { %v1727_v4 = vpop.f32.mrf.mxu1  ;;  %v2158_v11 = vpop.f32.mrf.mxu0 }
 0x165   : > { %v6812_v41 = vadd.f32 %v5441_v61, %v1835_v16  ;;  %v1834_v34 = vadd.f32 %v1727_v4, %v6605_v10 }
 0x166   : > { %v5386_v45 = vpop.f32.mrf.mxu1  ;;  %v5444_v13 = vpop.f32.mrf.mxu0 }
 0x167   : > { %v6815_v56 = vadd.f32 %v2158_v11, %v1834_v34  ;;  %v1837_v54 = vadd.f32 %v5386_v45, %v6614_v25 }
 0x168   : > { %v1737_v1 = vpop.f32.mrf.mxu1  ;;  %v2168_v38 = vpop.f32.mrf.mxu0 }
 0x169   : > { %v6818_v24 = vadd.f32 %v5444_v13, %v1837_v54  ;;  %v1836_v22 = vadd.f32 %v1737_v1, %v6619_v18 }
 0x16a   : > { %v5389_v51 = vpop.f32.mrf.mxu1  ;;  %v5447_v19 = vpop.f32.mrf.mxu0 }
 0x16b   : > { %v6821_v52 = vadd.f32 %v2168_v38, %v1836_v22  ;;  %v1839_v0 = vadd.f32 %v5389_v51, %v6628_v31 }
 0x16c   : > { %v1747_v5 = vpop.f32.mrf.mxu1  ;;  %v2178_v10 = vpop.f32.mrf.mxu0 }
 0x16d   : > { %v6824_v63 = vadd.f32 %v5447_v19, %v1839_v0  ;;  %v1838_v33 = vadd.f32 %v1747_v5, %v6633_v53 }
 0x16e   : > { %v5392_v23 = vpop.f32.mrf.mxu1  ;;  %v5450_v25 = vpop.f32.mrf.mxu0 }
 0x16f   : > { %v6827_v21 = vadd.f32 %v2178_v10, %v1838_v33  ;;  %v1841_v42 = vadd.f32 %v5392_v23, %v6642_v48 }
 0x170   : > { %v1757_v47 = vpop.f32.mrf.mxu1  ;;  %v2188_v18 = vpop.f32.mrf.mxu0 }
 0x171   : > { %v6830_v30 = vadd.f32 %v5450_v25, %v1841_v42  ;;  %v1840_v46 = vadd.f32 %v1757_v47, %v6647_v49 }
 0x172   : > { %v5395_v37 = vpop.f32.mrf.mxu1  ;;  %v5453_v31 = vpop.f32.mrf.mxu0 }
 0x173   : > { %v6833_v57 = vadd.f32 %v2188_v18, %v1840_v46  ;;  %v1843_v61 = vadd.f32 %v5395_v37, %v6656_v60 }
 0x174   : > { %v1767_v16 = vpop.f32.mrf.mxu1  ;;  %v2198_v53 = vpop.f32.mrf.mxu0 }
 0x175   : > { %v6836_v4 = vadd.f32 %v5453_v31, %v1843_v61  ;;  %v1842_v11 = vadd.f32 %v1767_v16, %v6661_v27 }
 0x176   : > { %v5398_v34 = vpop.f32.mrf.mxu1  ;;  %v5456_v48 = vpop.f32.mrf.mxu0 }
 0x177   : > { %v6839_v45 = vadd.f32 %v2198_v53, %v1842_v11  ;;  %v1845_v13 = vadd.f32 %v5398_v34, %v6670_v8 }
 0x178   : > { %v1777_v54 = vpop.f32.mrf.mxu1  ;;  %v2208_v49 = vpop.f32.mrf.mxu0 }
 0x179   : > { %v6842_v1 = vadd.f32 %v5456_v48, %v1845_v13  ;;  %v1844_v38 = vadd.f32 %v1777_v54, %v6675_v43 }
 0x17a   : > { %v5401_v22 = vpop.f32.mrf.mxu1  ;;  %v5459_v60 = vpop.f32.mrf.mxu0 }
 0x17b   : > { %v6845_v51 = vadd.f32 %v2208_v49, %v1844_v38  ;;  %v1847_v19 = vadd.f32 %v5401_v22, %v6684_v59 }
 0x17c   : > { %v1787_v0 = vpop.f32.mrf.mxu1  ;;  %v2218_v27 = vpop.f32.mrf.mxu0 }
 0x17d   : > { %v6848_v5 = vadd.f32 %v5459_v60, %v1847_v19  ;;  %v1846_v10 = vadd.f32 %v1787_v0, %v6689_v12 }
 0x17e   : > { %v5404_v33 = vpop.f32.mrf.mxu1  ;;  %v5462_v8 = vpop.f32.mrf.mxu0 }
 0x17f   : > { %v6851_v23 = vadd.f32 %v2218_v27, %v1846_v10  ;;  %v1849_v25 = vadd.f32 %v5404_v33, %v6698_v3 }
 0x180   : > { %v1797_v42 = vpop.f32.mrf.mxu1  ;;  %v2228_v43 = vpop.f32.mrf.mxu0 }
 0x181   : > { %v6854_v47 = vadd.f32 %v5462_v8, %v1849_v25  ;;  %v1848_v18 = vadd.f32 %v1797_v42, %v6703_v36 }
 0x182   : > { %v5407_v46 = vpop.f32.mrf.mxu1  ;;  %v5465_v59 = vpop.f32.mrf.mxu0 }
 0x183   : > { %v6857_v37 = vadd.f32 %v2228_v43, %v1848_v18  ;;  %v1851_v31 = vadd.f32 %v5407_v46, %v6712_v14 }
 0x184   : > { %v1807_v61 = vpop.f32.mrf.mxu1  ;;  %v2238_v12 = vpop.f32.mrf.mxu0 }
 0x185   : > { %v6860_v16 = vadd.f32 %v5465_v59, %v1851_v31  ;;  %v1850_v53 = vadd.f32 %v1807_v61, %v6717_v50 }
 0x186   : > { %v5472_v11 = vpop.f32.mrf.mxu1  ;;  %v5530_v3 = vpop.f32.mrf.mxu0 }
 0x187   : > { %v6863_v34 = vadd.f32 %v2238_v12, %v1850_v53  ;;  %v2679_v48 = vadd.f32 %v5472_v11, %v6726_v20 }
 0x188   : > { %v2499_v13 = vpop.f32.mrf.mxu1  ;;  %v2930_v36 = vpop.f32.mrf.mxu0 }
 0x189   : > { %v6866_v54 = vadd.f32 %v5530_v3, %v2679_v48  ;;  %v2678_v49 = vadd.f32 %v2499_v13, %v6731_v15 }
 0x18a   : > { %v5475_v38 = vpop.f32.mrf.mxu1  ;;  %v5533_v14 = vpop.f32.mrf.mxu0 }
 0x18b   : > { %v6869_v22 = vadd.f32 %v2930_v36, %v2678_v49  ;;  %v2681_v60 = vadd.f32 %v5475_v38, %v6740_v26 }
 0x18c   : > { %v2509_v19 = vpop.f32.mrf.mxu1  ;;  %v2940_v50 = vpop.f32.mrf.mxu0 }
 0x18d   : > { %v6872_v0 = vadd.f32 %v5533_v14, %v2681_v60  ;;  %v2680_v27 = vadd.f32 %v2509_v19, %v6745_v39 }
 0x18e   : > { %v5478_v10 = vpop.f32.mrf.mxu1  ;;  %v5536_v20 = vpop.f32.mrf.mxu0 }
 0x18f   : > { %v6875_v33 = vadd.f32 %v2940_v50, %v2680_v27  ;;  %v2683_v8 = vadd.f32 %v5478_v10, %v6754_v32 }
 0x190   : > { %v2519_v25 = vpop.f32.mrf.mxu1  ;;  %v2950_v15 = vpop.f32.mrf.mxu0 }
 0x191   : > { %v6878_v42 = vadd.f32 %v5536_v20, %v2683_v8  ;;  %v2682_v43 = vadd.f32 %v2519_v25, %v6759_v62 }
 0x192   : > { %v5481_v18 = vpop.f32.mrf.mxu1  ;;  %v5539_v26 = vpop.f32.mrf.mxu0 }
 0x193   : > { %v6881_v46 = vadd.f32 %v2950_v15, %v2682_v43  ;;  %v2685_v59 = vadd.f32 %v5481_v18, %v6768_v44 }
 0x194   : > { %v2529_v31 = vpop.f32.mrf.mxu1  ;;  %v2960_v39 = vpop.f32.mrf.mxu0 }
 0x195   : > { %v6884_v61 = vadd.f32 %v5539_v26, %v2685_v59  ;;  %v2684_v12 = vadd.f32 %v2529_v31, %v6773_v40 }
 0x196   : > { %v5484_v53 = vpop.f32.mrf.mxu1  ;;  %v5542_v32 = vpop.f32.mrf.mxu0 }
 0x197   : > { %v6887_v11 = vadd.f32 %v2960_v39, %v2684_v12  ;;  %v2687_v3 = vadd.f32 %v5484_v53, %v6780_v9 }
 0x198   : > { %v2539_v48 = vpop.f32.mrf.mxu1  ;;  %v2970_v62 = vpop.f32.mrf.mxu0 }
 0x199   : > { %v6890_v13 = vadd.f32 %v5542_v32, %v2687_v3  ;;  %v2686_v36 = vadd.f32 %v2539_v48, %v6785_v29 }
 0x19a   : > { %v5487_v49 = vpop.f32.mrf.mxu1  ;;  %v5545_v44 = vpop.f32.mrf.mxu0 }
 0x19b   : > { %v6893_v38 = vadd.f32 %v2970_v62, %v2686_v36  ;;  %v2689_v14 = vadd.f32 %v5487_v49, %v6788_v58 }
 0x19c   : > { %v2549_v60 = vpop.f32.mrf.mxu1  ;;  %v2980_v40 = vpop.f32.mrf.mxu0 }
 0x19d   : > { %v6896_v19 = vadd.f32 %v5545_v44, %v2689_v14  ;;  %v2688_v50 = vadd.f32 %v2549_v60, %v6791_v17 }
 0x19e   : > { %v5490_v27 = vpop.f32.mrf.mxu1  ;;  %v5548_v9 = vpop.f32.mrf.mxu0 }
 0x19f   : > { %v6899_v10 = vadd.f32 %v2980_v40, %v2688_v50  ;;  %v2691_v20 = vadd.f32 %v5490_v27, %v6794_v35 }
 0x1a0   : > { %v2559_v8 = vpop.f32.mrf.mxu1  ;;  %v2990_v29 = vpop.f32.mrf.mxu0 }
 0x1a1   : > { %v6902_v25 = vadd.f32 %v5548_v9, %v2691_v20  ;;  %v2690_v15 = vadd.f32 %v2559_v8, %v6797_v6 }
 0x1a2   : > { %v5493_v43 = vpop.f32.mrf.mxu1  ;;  %v5551_v58 = vpop.f32.mrf.mxu0 }
 0x1a3   : > { %v6905_v18 = vadd.f32 %v2990_v29, %v2690_v15  ;;  %v2693_v26 = vadd.f32 %v5493_v43, %v6800_v7 }
 0x1a4   : > { %v2569_v59 = vpop.f32.mrf.mxu1  ;;  %v3000_v17 = vpop.f32.mrf.mxu0 }
 0x1a5   : > { %v6908_v31 = vadd.f32 %v5551_v58, %v2693_v26  ;;  %v2692_v39 = vadd.f32 %v2569_v59, %v6803_v28 }
 0x1a6   : > { %v5496_v12 = vpop.f32.mrf.mxu1  ;;  %v5554_v35 = vpop.f32.mrf.mxu0 }
 0x1a7   : > { %v6911_v53 = vadd.f32 %v3000_v17, %v2692_v39  ;;  %v2695_v32 = vadd.f32 %v5496_v12, %v6806_v2 }
 0x1a8   : > { %v2579_v3 = vpop.f32.mrf.mxu1  ;;  %v3010_v6 = vpop.f32.mrf.mxu0 }
 0x1a9   : > { %v6914_v48 = vadd.f32 %v5554_v35, %v2695_v32  ;;  %v2694_v62 = vadd.f32 %v2579_v3, %v6809_v55 }
 0x1aa   : > { %v5499_v36 = vpop.f32.mrf.mxu1  ;;  %v5557_v7 = vpop.f32.mrf.mxu0 }
 0x1ab   : > { %v6917_v49 = vadd.f32 %v3010_v6, %v2694_v62  ;;  %v2697_v44 = vadd.f32 %v5499_v36, %v6812_v41 }
 0x1ac   : > { %v2589_v14 = vpop.f32.mrf.mxu1  ;;  %v3020_v28 = vpop.f32.mrf.mxu0 }
 0x1ad   : > { %v6920_v60 = vadd.f32 %v5557_v7, %v2697_v44  ;;  %v2696_v40 = vadd.f32 %v2589_v14, %v6815_v56 }
 0x1ae   : > { %v5502_v50 = vpop.f32.mrf.mxu1  ;;  %v5560_v2 = vpop.f32.mrf.mxu0 }
 0x1af   : > { %v6923_v27 = vadd.f32 %v3020_v28, %v2696_v40  ;;  %v2699_v9 = vadd.f32 %v5502_v50, %v6818_v24 }
 0x1b0   : > { %v2599_v20 = vpop.f32.mrf.mxu1  ;;  %v3030_v55 = vpop.f32.mrf.mxu0 }
 0x1b1   : > { %v6926_v8 = vadd.f32 %v5560_v2, %v2699_v9  ;;  %v2698_v29 = vadd.f32 %v2599_v20, %v6821_v52 }
 0x1b2   : > { %v5505_v15 = vpop.f32.mrf.mxu1  ;;  %v5563_v41 = vpop.f32.mrf.mxu0 }
 0x1b3   : > { %v6929_v43 = vadd.f32 %v3030_v55, %v2698_v29  ;;  %v2701_v58 = vadd.f32 %v5505_v15, %v6824_v63 }
 0x1b4   : > { %v2609_v26 = vpop.f32.mrf.mxu1  ;;  %v3040_v56 = vpop.f32.mrf.mxu0 }
 0x1b5   : > { %v6932_v59 = vadd.f32 %v5563_v41, %v2701_v58  ;;  %v2700_v17 = vadd.f32 %v2609_v26, %v6827_v21 }
 0x1b6   : > { %v5508_v39 = vpop.f32.mrf.mxu1  ;;  %v5566_v24 = vpop.f32.mrf.mxu0 }
 0x1b7   : > { %v6935_v12 = vadd.f32 %v3040_v56, %v2700_v17  ;;  %v2703_v35 = vadd.f32 %v5508_v39, %v6830_v30 }
 0x1b8   : > { %v2619_v32 = vpop.f32.mrf.mxu1  ;;  %v3050_v52 = vpop.f32.mrf.mxu0 }
 0x1b9   : > { %v6938_v3 = vadd.f32 %v5566_v24, %v2703_v35  ;;  %v2702_v6 = vadd.f32 %v2619_v32, %v6833_v57 }
 0x1ba   : > { %v5511_v62 = vpop.f32.mrf.mxu1  ;;  %v5569_v63 = vpop.f32.mrf.mxu0 }
 0x1bb   : > { %v6941_v36 = vadd.f32 %v3050_v52, %v2702_v6  ;;  %v2705_v7 = vadd.f32 %v5511_v62, %v6836_v4 }
 0x1bc   : > { %v2629_v44 = vpop.f32.mrf.mxu1  ;;  %v3060_v21 = vpop.f32.mrf.mxu0 }
 0x1bd   : > { %v6944_v14 = vadd.f32 %v5569_v63, %v2705_v7  ;;  %v2704_v28 = vadd.f32 %v2629_v44, %v6839_v45 }
 0x1be   : > { %v5514_v40 = vpop.f32.mrf.mxu1  ;;  %v5572_v30 = vpop.f32.mrf.mxu0 }
 0x1bf   : > { %v6947_v50 = vadd.f32 %v3060_v21, %v2704_v28  ;;  %v2707_v2 = vadd.f32 %v5514_v40, %v6842_v1 }
 0x1c0   : > { %v2639_v9 = vpop.f32.mrf.mxu1  ;;  %v3070_v57 = vpop.f32.mrf.mxu0 }
 0x1c1   : > { %v6950_v20 = vadd.f32 %v5572_v30, %v2707_v2  ;;  %v2706_v55 = vadd.f32 %v2639_v9, %v6845_v51 }
 0x1c2   : > { %v5517_v29 = vpop.f32.mrf.mxu1  ;;  %v5575_v4 = vpop.f32.mrf.mxu0 }
 0x1c3   : > { %v6953_v15 = vadd.f32 %v3070_v57, %v2706_v55  ;;  %v2709_v41 = vadd.f32 %v5517_v29, %v6848_v5 }
 0x1c4   : > { %v2649_v58 = vpop.f32.mrf.mxu1  ;;  %v3080_v45 = vpop.f32.mrf.mxu0 }
 0x1c5   : > { %v6956_v26 = vadd.f32 %v5575_v4, %v2709_v41  ;;  %v2708_v56 = vadd.f32 %v2649_v58, %v6851_v23 }
 0x1c6   : > { %v5520_v17 = vpop.f32.mrf.mxu1  ;;  %v5578_v1 = vpop.f32.mrf.mxu0 }
 0x1c7   : > { %v6959_v39 = vadd.f32 %v3080_v45, %v2708_v56  ;;  %v2711_v24 = vadd.f32 %v5520_v17, %v6854_v47 }
 0x1c8   : > { %v2659_v35 = vpop.f32.mrf.mxu1  ;;  %v3090_v51 = vpop.f32.mrf.mxu0 }
 0x1c9   : > { %v6962_v32 = vadd.f32 %v5578_v1, %v2711_v24  ;;  %v2710_v52 = vadd.f32 %v2659_v35, %v6857_v37 }
 0x1ca   : > { %v5523_v6 = vpop.f32.mrf.mxu1  ;;  %v5581_v5 = vpop.f32.mrf.mxu0 }
 0x1cb   : > { %v6965_v62 = vadd.f32 %v3090_v51, %v2710_v52  ;;  %v2713_v63 = vadd.f32 %v5523_v6, %v6860_v16 }
 0x1cc   : > { %v2669_v7 = vpop.f32.mrf.mxu1  ;;  %v3100_v23 = vpop.f32.mrf.mxu0 }
 0x1cd   : > { %v6968_v44 = vadd.f32 %v5581_v5, %v2713_v63  ;;  %v2712_v21 = vadd.f32 %v2669_v7, %v6863_v34 }
 0x1ce   : > { %v5588_v28 = vpop.f32.mrf.mxu1  ;;  %v5646_v47 = vpop.f32.mrf.mxu0 }
 0x1cf   : > { %v6971_v40 = vadd.f32 %v3100_v23, %v2712_v21  ;;  %v3541_v30 = vadd.f32 %v5588_v28, %v6866_v54 }
 0x1d0   : > { %v3361_v2 = vpop.f32.mrf.mxu1  ;;  %v3792_v37 = vpop.f32.mrf.mxu0 }
 0x1d1   : > { %v6974_v9 = vadd.f32 %v5646_v47, %v3541_v30  ;;  %v3540_v57 = vadd.f32 %v3361_v2, %v6869_v22 }
 0x1d2   : > { %v5591_v55 = vpop.f32.mrf.mxu1  ;;  %v5649_v16 = vpop.f32.mrf.mxu0 }
 0x1d3   : > { %v3543_v29 = vadd.f32 %v5591_v55, %v6872_v0  ;;  %4196 = vrot.lane.b32.xlu0 %v6974_v9, %s5720_s29  ;;  %v6980_v41 = vadd.f32 %v3792_v37, %v3540_v57 }
 0x1d4   : > { %v3371_v34 = vpop.f32.mrf.mxu1  ;;  %v3802_v4 = vpop.f32.mrf.mxu0 }
 0x1d5   : > { %v6982_v58 = vadd.f32 %v5649_v16, %v3543_v29  ;;  %v3542_v54 = vadd.f32 %v3371_v34, %v6875_v33 }
 0x1d6   : > { %v5594_v45 = vpop.f32.mrf.mxu1  ;;  %v5652_v56 = vpop.f32.mrf.mxu0 }
 0x1d7   : > { %4200 = vrot.lane.b32.xlu1 %v6982_v58, %s5720_s29  ;;  %4194 = vrot.lane.b32.xlu0 %v6980_v41, %s5720_s29  ;;  %v6989_v17 = vadd.f32 %v3802_v4, %v3542_v54  ;;  %v3545_v1 = vadd.f32 %v5594_v45, %v6878_v42 }
 0x1d8   : > { %v3381_v22 = vpop.f32.mrf.mxu1  ;;  %v3812_v0 = vpop.f32.mrf.mxu0 }
 0x1d9   : > { %v3544_v24 = vadd.f32 %v3381_v22, %v6881_v46  ;;  %v6997_v5 = vadd.f32 %v5652_v56, %v3545_v1 }
 0x1da   : > { %v5597_v35 = vpop.f32.mrf.mxu1  ;;  %v5655_v51 = vpop.f32.mrf.mxu0 }
 0x1db   : > { %v6993_v52 = vadd.f32 %v3812_v0, %v3544_v24  ;;  %4198 = vrot.lane.b32.xlu1 %v6989_v17, %s5720_s29  ;;  %v3547_v63 = vadd.f32 %v5597_v35, %v6884_v61 }
 0x1dc   : > { %v3391_v33 = vpop.f32.mrf.mxu1  ;;  %v3822_v6 = vpop.f32.mrf.mxu0 }
 0x1dd   : > { %v3546_v7 = vadd.f32 %v3391_v33, %v6887_v11  ;;  %4202 = vrot.lane.b32.xlu0 %v6993_v52, %s5720_s29  ;;  %v7007_v47 = vadd.f32 %v5655_v51, %v3547_v63 }
 0x1de   : > { %v5600_v42 = vpop.f32.mrf.mxu1  ;;  %v5658_v46 = vpop.f32.mrf.mxu0 }
 0x1df   : > { %v7003_v23 = vadd.f32 %v3822_v6, %v3546_v7  ;;  %4204 = vrot.lane.b32.xlu1 %v6997_v5, %s5720_s29  ;;  %v3549_v30 = vadd.f32 %v5600_v42, %v6890_v13 }
 0x1e0   : > { %v3401_v21 = vpop.f32.mrf.mxu1  ;;  %v3832_v28 = vpop.f32.mrf.mxu0 }
 0x1e1   : > { %v3548_v61 = vadd.f32 %v3401_v21, %v6893_v38  ;;  %4206 = vrot.lane.b32.xlu0 %v7003_v23, %s5720_s29  ;;  %v7017_v16 = vadd.f32 %v5658_v46, %v3549_v30 }
 0x1e2   : > { %v5603_v11 = vpop.f32.mrf.mxu1  ;;  %v5661_v2 = vpop.f32.mrf.mxu0 }
 0x1e3   : > { %v7013_v37 = vadd.f32 %v3832_v28, %v3548_v61  ;;  %4208 = vrot.lane.b32.xlu1 %v7007_v47, %s5720_s29  ;;  %v3551_v29 = vadd.f32 %v5603_v11, %v6896_v19 }
 0x1e4   : > { %v3411_v57 = vpop.f32.mrf.mxu1  ;;  %v3842_v55 = vpop.f32.mrf.mxu0 }
 0x1e5   : > { %v3550_v13 = vadd.f32 %v3411_v57, %v6899_v10  ;;  %4210 = vrot.lane.b32.xlu0 %v7013_v37, %s5720_s29  ;;  %v7027_v56 = vadd.f32 %v5661_v2, %v3551_v29 }
 0x1e6   : > { %v5606_v38 = vpop.f32.mrf.mxu1  ;;  %v5664_v34 = vpop.f32.mrf.mxu0 }
 0x1e7   : > { %v7023_v4 = vadd.f32 %v3842_v55, %v3550_v13  ;;  %4212 = vrot.lane.b32.xlu1 %v7017_v16, %s5720_s29  ;;  %v3553_v22 = vadd.f32 %v5606_v38, %v6902_v25 }
 0x1e8   : > { %v3421_v54 = vpop.f32.mrf.mxu1  ;;  %v3852_v45 = vpop.f32.mrf.mxu0 }
 0x1e9   : > { %v3552_v19 = vadd.f32 %v3421_v54, %v6905_v18  ;;  %4214 = vrot.lane.b32.xlu0 %v7023_v4, %s5720_s29  ;;  %v7037_v51 = vadd.f32 %v5664_v34, %v3553_v22 }
 0x1ea   : > { %v5609_v10 = vpop.f32.mrf.mxu1  ;;  %v5667_v0 = vpop.f32.mrf.mxu0 }
 0x1eb   : > { %v7033_v1 = vadd.f32 %v3852_v45, %v3552_v19  ;;  %4216 = vrot.lane.b32.xlu1 %v7027_v56, %s5720_s29  ;;  %v3555_v33 = vadd.f32 %v5609_v10, %v6908_v31 }
 0x1ec   : > { %v3431_v24 = vpop.f32.mrf.mxu1  ;;  %v3862_v35 = vpop.f32.mrf.mxu0 }
 0x1ed   : > { %v3554_v25 = vadd.f32 %v3431_v24, %v6911_v53  ;;  %4218 = vrot.lane.b32.xlu0 %v7033_v1, %s5720_s29  ;;  %v7047_v46 = vadd.f32 %v5667_v0, %v3555_v33 }
 0x1ee   : > { %v5612_v18 = vpop.f32.mrf.mxu1  ;;  %v5670_v6 = vpop.f32.mrf.mxu0 }
 0x1ef   : > { %v7043_v63 = vadd.f32 %v3862_v35, %v3554_v25  ;;  %4220 = vrot.lane.b32.xlu1 %v7037_v51, %s5720_s29  ;;  %v3557_v21 = vadd.f32 %v5612_v18, %v6914_v48 }
 0x1f0   : > { %v3441_v7 = vpop.f32.mrf.mxu1  ;;  %v3872_v42 = vpop.f32.mrf.mxu0 }
 0x1f1   : > { %v3556_v31 = vadd.f32 %v3441_v7, %v6917_v49  ;;  %4222 = vrot.lane.b32.xlu0 %v7043_v63, %s5720_s29  ;;  %v7057_v2 = vadd.f32 %v5670_v6, %v3557_v21 }
 0x1f2   : > { %v5615_v53 = vpop.f32.mrf.mxu1  ;;  %v5673_v28 = vpop.f32.mrf.mxu0 }
 0x1f3   : > { %v7053_v30 = vadd.f32 %v3872_v42, %v3556_v31  ;;  %4224 = vrot.lane.b32.xlu1 %v7047_v46, %s5720_s29  ;;  %v3559_v57 = vadd.f32 %v5615_v53, %v6920_v60 }
 0x1f4   : > { %v3451_v61 = vpop.f32.mrf.mxu1  ;;  %v3882_v11 = vpop.f32.mrf.mxu0 }
 0x1f5   : > { %v3558_v48 = vadd.f32 %v3451_v61, %v6923_v27  ;;  %4226 = vrot.lane.b32.xlu0 %v7053_v30, %s5720_s29  ;;  %v7067_v34 = vadd.f32 %v5673_v28, %v3559_v57 }
 0x1f6   : > { %v5618_v49 = vpop.f32.mrf.mxu1  ;;  %v5676_v55 = vpop.f32.mrf.mxu0 }
 0x1f7   : > { %v7063_v29 = vadd.f32 %v3882_v11, %v3558_v48  ;;  %4228 = vrot.lane.b32.xlu1 %v7057_v2, %s5720_s29  ;;  %v3561_v54 = vadd.f32 %v5618_v49, %v6926_v8 }
 0x1f8   : > { %v3461_v13 = vpop.f32.mrf.mxu1  ;;  %v3892_v38 = vpop.f32.mrf.mxu0 }
 0x1f9   : > { %v3560_v60 = vadd.f32 %v3461_v13, %v6929_v43  ;;  %4230 = vrot.lane.b32.xlu0 %v7063_v29, %s5720_s29  ;;  %v7077_v0 = vadd.f32 %v5676_v55, %v3561_v54 }
 0x1fa   : > { %v5621_v27 = vpop.f32.mrf.mxu1  ;;  %v5679_v45 = vpop.f32.mrf.mxu0 }
 0x1fb   : > { %v7073_v22 = vadd.f32 %v3892_v38, %v3560_v60  ;;  %4232 = vrot.lane.b32.xlu1 %v7067_v34, %s5720_s29  ;;  %v3563_v24 = vadd.f32 %v5621_v27, %v6932_v59 }
 0x1fc   : > { %v3471_v19 = vpop.f32.mrf.mxu1  ;;  %v3902_v10 = vpop.f32.mrf.mxu0 }
 0x1fd   : > { %v3562_v8 = vadd.f32 %v3471_v19, %v6935_v12  ;;  %4234 = vrot.lane.b32.xlu0 %v7073_v22, %s5720_s29  ;;  %v7087_v6 = vadd.f32 %v5679_v45, %v3563_v24 }
 0x1fe   : > { %v5624_v43 = vpop.f32.mrf.mxu1  ;;  %v5682_v35 = vpop.f32.mrf.mxu0 }
 0x1ff   : > { %v7083_v33 = vadd.f32 %v3902_v10, %v3562_v8  ;;  %4236 = vrot.lane.b32.xlu1 %v7077_v0, %s5720_s29  ;;  %v3565_v7 = vadd.f32 %v5624_v43, %v6938_v3 }
 0x200   : > { %v3481_v25 = vpop.f32.mrf.mxu1  ;;  %v3912_v18 = vpop.f32.mrf.mxu0 }
 0x201   : > { %v3564_v59 = vadd.f32 %v3481_v25, %v6941_v36  ;;  %4238 = vrot.lane.b32.xlu0 %v7083_v33, %s5720_s29  ;;  %v7097_v28 = vadd.f32 %v5682_v35, %v3565_v7 }
 0x202   : > { %v5627_v12 = vpop.f32.mrf.mxu1  ;;  %v5685_v42 = vpop.f32.mrf.mxu0 }
 0x203   : > { %v7093_v21 = vadd.f32 %v3912_v18, %v3564_v59  ;;  %4240 = vrot.lane.b32.xlu1 %v7087_v6, %s5720_s29  ;;  %v3567_v61 = vadd.f32 %v5627_v12, %v6944_v14 }
 0x204   : > { %v3491_v31 = vpop.f32.mrf.mxu1  ;;  %v3922_v53 = vpop.f32.mrf.mxu0 }
 0x205   : > { %v3566_v3 = vadd.f32 %v3491_v31, %v6947_v50  ;;  %4242 = vrot.lane.b32.xlu0 %v7093_v21, %s5720_s29  ;;  %v7107_v55 = vadd.f32 %v5685_v42, %v3567_v61 }
 0x206   : > { %v5630_v36 = vpop.f32.mrf.mxu1  ;;  %v5688_v11 = vpop.f32.mrf.mxu0 }
 0x207   : > { %v7103_v57 = vadd.f32 %v3922_v53, %v3566_v3  ;;  %4244 = vrot.lane.b32.xlu1 %v7097_v28, %s5720_s29  ;;  %v3569_v13 = vadd.f32 %v5630_v36, %v6950_v20 }
 0x208   : > { %v3501_v48 = vpop.f32.mrf.mxu1  ;;  %v3932_v49 = vpop.f32.mrf.mxu0 }
 0x209   : > { %v3568_v14 = vadd.f32 %v3501_v48, %v6953_v15  ;;  %4246 = vrot.lane.b32.xlu0 %v7103_v57, %s5720_s29  ;;  %v7117_v45 = vadd.f32 %v5688_v11, %v3569_v13  ;;  %v7170_v48 = vld [vmem:[%s7355_s3] ss:$0 sm:$0xff] }
 0x20a   : > { %v5633_v50 = vpop.f32.mrf.mxu1  ;;  %v5691_v38 = vpop.f32.mrf.mxu0 }
 0x20b   : > { %v7113_v54 = vadd.f32 %v3932_v49, %v3568_v14  ;;  %4248 = vrot.lane.b32.xlu1 %v7107_v55, %s5720_s29  ;;  %v3571_v19 = vadd.f32 %v5633_v50, %v6956_v26 }
 0x20c   : > { %v3511_v60 = vpop.f32.mrf.mxu1  ;;  %v3942_v27 = vpop.f32.mrf.mxu0 }
 0x20d   : > { %v3570_v20 = vadd.f32 %v3511_v60, %v6959_v39  ;;  %4250 = vrot.lane.b32.xlu0 %v7113_v54, %s5720_s29  ;;  %v7127_v35 = vadd.f32 %v5691_v38, %v3571_v19 }
 0x20e   : > { %v5636_v15 = vpop.f32.mrf.mxu1  ;;  %v5694_v10 = vpop.f32.mrf.mxu0 }
 0x20f   : > { %v7123_v24 = vadd.f32 %v3942_v27, %v3570_v20  ;;  %4252 = vrot.lane.b32.xlu1 %v7117_v45, %s5720_s29  ;;  %v3573_v25 = vadd.f32 %v5636_v15, %v6962_v32 }
 0x210   : > { %v3521_v8 = vpop.f32.mrf.mxu1  ;;  %v3952_v43 = vpop.f32.mrf.mxu0 }
 0x211   : > { %v3572_v26 = vadd.f32 %v3521_v8, %v6965_v62  ;;  %4254 = vrot.lane.b32.xlu0 %v7123_v24, %s5720_s29  ;;  %v7137_v42 = vadd.f32 %v5694_v10, %v3573_v25 }
 0x212   : > { %v5639_v39 = vpop.f32.mrf.mxu1  ;;  %v5697_v18 = vpop.f32.mrf.mxu0 }
 0x213   : > { %v7133_v7 = vadd.f32 %v3952_v43, %v3572_v26  ;;  %4256 = vrot.lane.b32.xlu1 %v7127_v35, %s5720_s29  ;;  %v3575_v31 = vadd.f32 %v5639_v39, %v6968_v44  ;;  %v7157_v44 = vld [vmem:[%s7354_s2] ss:$0 sm:$0xff] }
 0x214   : > { %v3531_v59 = vpop.f32.mrf.mxu1  ;;  %v3962_v12 = vpop.f32.mrf.mxu0  ;;  %v4014_v61 = vadd.f32 %v7157_v44, %v6980_v41  ;;  %v4017_v3 = vadd.f32 %v7157_v44, %v6982_v58  ;;  %v4016_v11 = vadd.f32 %v7157_v44, %v6989_v17  ;;  %v4018_v41 = vadd.f32 %v7157_v44, %v6993_v52 }
 0x215   : > { %v3574_v32 = vadd.f32 %v3531_v59, %v6971_v40  ;;  %4258 = vrot.lane.b32.xlu0 %v7133_v7, %s5720_s29  ;;  %v7147_v53 = vadd.f32 %v5697_v18, %v3575_v31  ;;  %v4015_v40 = vadd.f32 %v7157_v44, %v6974_v9  ;;  %v4019_v17 = vadd.f32 %v7157_v44, %v6997_v5 }
 0x216   : > { %v4089_v13 = vmul.f32 0.01, %v4017_v3  ;;  %v4086_v14 = vmul.f32 0.01, %v4014_v61  ;;  %vm4053_vm3 = vcmp.ge.f32.partialorder %v4017_v3, 0.0  ;;  %vm4050_vm4 = vcmp.ge.f32.partialorder %v4014_v61, 0.0 }
 0x217   : > { %v7143_v62 = vadd.f32 %v3962_v12, %v3574_v32  ;;  %4260 = vrot.lane.b32.xlu1 %v7137_v42, %s5720_s29  ;;  %v4087_v36 = vmul.f32 0.01, %v4015_v40  ;;  %vm4051_vm2 = vcmp.ge.f32.partialorder %v4015_v40, 0.0  ;;  %v4088_v20 = vmul.f32 0.01, %v4016_v11 }
 0x218   : > { %v4125_v60 = vsel %vm4053_vm3, %v4017_v3, %v4089_v13  ;;  %v4122_v19 = vsel %vm4050_vm4, %v4014_v61, %v4086_v14  ;;  %vm4052_vm6 = vcmp.ge.f32.partialorder %v4016_v11, 0.0  ;;  %v4020_v10 = vadd.f32 %v7157_v44, %v7003_v23 }
 0x219   : > { %4262 = vrot.lane.b32.xlu0 %v7143_v62, %s5720_s29  ;;  %v4123_v9 = vsel %vm4051_vm2, %v4015_v40, %v4087_v36  ;;  %v4090_v8 = vmul.f32 0.01, %v4018_v41  ;;  %vm4054_vm7 = vcmp.ge.f32.partialorder %v4018_v41, 0.0  ;;  %v4021_v25 = vadd.f32 %v7157_v44, %v7007_v47 }
 0x21a   : > { %v4124_v39 = vsel %vm4052_vm6, %v4016_v11, %v4088_v20  ;;  %v4091_v18 = vmul.f32 0.01, %v4019_v17  ;;  %vm4055_vm8 = vcmp.ge.f32.partialorder %v4019_v17, 0.0  ;;  %v4022_v23 = vadd.f32 %v7157_v44, %v7013_v37 }
 0x21b   : > { %4264 = vrot.lane.b32.xlu1 %v7147_v53, %s5720_s29  ;;  %v4126_v12 = vsel %vm4054_vm7, %v4018_v41, %v4090_v8  ;;  %v4092_v32 = vmul.f32 0.01, %v4020_v10  ;;  %vm4056_vm9 = vcmp.ge.f32.partialorder %v4020_v10, 0.0  ;;  %v4023_v61 = vadd.f32 %v7157_v44, %v7017_v16 }
 0x21c   : > { %v4127_v3 = vsel %vm4055_vm8, %v4019_v17, %v4091_v18  ;;  %v4093_v11 = vmul.f32 0.01, %v4021_v25  ;;  %vm4057_vm10 = vcmp.ge.f32.partialorder %v4021_v25, 0.0  ;;  %vm4058_vm11 = vcmp.ge.f32.partialorder %v4022_v23, 0.0 }
 0x21d   : > { %v4128_v13 = vsel %vm4056_vm9, %v4020_v10, %v4092_v32  ;;  %vm4059_vm12 = vcmp.ge.f32.partialorder %v4023_v61, 0.0  ;;  %v4027_v8 = vadd.f32 %v7157_v44, %v7037_v51 }
 0x21e   : > { %v4129_v17 = vsel %vm4057_vm10, %v4021_v25, %v4093_v11 }
 0x21f   : > { %vm4063_vm0 = vcmp.ge.f32.partialorder %v4027_v8, 0.0 }
 0x245   : > { %v4197_v49 = vpop.permute.xlu0 %4196 }
 0x246   : > { %v4303_v50 = vadd.f32 %v4197_v49, %v4123_v9  ;;  %v4024_v9 = vadd.f32 %v7157_v44, %v7023_v4 }
 0x248   : > { %v4346_v58 = vadd.f32 %v7170_v48, %v4303_v50  ;;  %v4094_v50 = vmul.f32 0.01, %v4022_v23  ;;  %vm4060_vm13 = vcmp.ge.f32.partialorder %v4024_v9, 0.0 }
 0x249   : > { %v4201_v38 = vpop.permute.xlu1 %4200  ;;  %v4195_v27 = vpop.permute.xlu0 %4194 }
 0x24a   : > { %4383 = vst.msk [vmem:[%s7177_s18 + $0x8] sm:$0xff] %vm4381_vm5, %v4346_v58  ;;  %v4305_v52 = vadd.f32 %v4201_v38, %v4125_v60  ;;  %v4302_v15 = vadd.f32 %v4195_v27, %v4122_v19  ;;  %v4025_v58 = vadd.f32 %v7157_v44, %v7027_v56  ;;  %v4095_v60 = vmul.f32 0.01, %v4023_v61 }
 0x24b   : > { %v4026_v19 = vadd.f32 %v7157_v44, %v7033_v1  ;;  %v4130_v20 = vsel %vm4058_vm11, %v4022_v23, %v4094_v50 }
 0x24c   : > { %v4348_v43 = vadd.f32 %v7170_v48, %v4305_v52  ;;  %v4345_v5 = vadd.f32 %v7170_v48, %v4302_v15  ;;  %v4096_v15 = vmul.f32 0.01, %v4024_v9  ;;  %v4097_v25 = vmul.f32 0.01, %v4025_v58 }
 0x24d   : > { %v4199_v26 = vpop.permute.xlu1 %4198  ;;  %vm4061_vm14 = vcmp.ge.f32.partialorder %v4025_v58, 0.0  ;;  %v4098_v23 = vmul.f32 0.01, %v4026_v19  ;;  %vm4062_vm15 = vcmp.ge.f32.partialorder %v4026_v19, 0.0 }
 0x24e   : > { %4385 = vst.msk [vmem:[%s7177_s18 + $0x18] sm:$0xff] %vm4381_vm5, %v4348_v43  ;;  %4382 = vst.msk [vmem:[%s7177_s18] sm:$0xff] %vm4381_vm5, %v4345_v5  ;;  %v4304_v59 = vadd.f32 %v4199_v26, %v4124_v39  ;;  %v4131_v43 = vsel %vm4059_vm12, %v4023_v61, %v4095_v60  ;;  %v4028_v39 = vadd.f32 %v7157_v44, %v7043_v63 }
 0x24f   : > { %v4203_v31 = vpop.permute.xlu0 %4202  ;;  %v4132_v18 = vsel %vm4060_vm13, %v4024_v9, %v4096_v15  ;;  %v4133_v32 = vsel %vm4061_vm14, %v4025_v58, %v4097_v25  ;;  %v4031_v9 = vadd.f32 %v7157_v44, %v7057_v2  ;;  %v4034_v15 = vadd.f32 %v7157_v44, %v7073_v22 }
 0x250   : > { %v4347_v40 = vadd.f32 %v7170_v48, %v4304_v59  ;;  %v4306_v47 = vadd.f32 %v4203_v31, %v4126_v12  ;;  %v4029_v31 = vadd.f32 %v7157_v44, %v7047_v46  ;;  %vm4064_vm1 = vcmp.ge.f32.partialorder %v4028_v39, 0.0 }
 0x251   : > { %v4205_v36 = vpop.permute.xlu1 %4204  ;;  %vm4067_vm4 = vcmp.ge.f32.partialorder %v4031_v9, 0.0  ;;  %vm4070_vm8 = vcmp.ge.f32.partialorder %v4034_v15, 0.0 }
 0x252   : > { %4384 = vst.msk [vmem:[%s7177_s18 + $0x10] sm:$0xff] %vm4381_vm5, %v4347_v40  ;;  %v4349_v49 = vadd.f32 %v7170_v48, %v4306_v47  ;;  %v4307_v37 = vadd.f32 %v4205_v36, %v4127_v3  ;;  %v4099_v47 = vmul.f32 0.01, %v4027_v8  ;;  %v4030_v3 = vadd.f32 %v7157_v44, %v7053_v30 }
 0x253   : > { %v4207_v14 = vpop.permute.xlu0 %4206  ;;  %v4134_v36 = vsel %vm4062_vm15, %v4026_v19, %v4098_v23  ;;  %v4101_v50 = vmul.f32 0.01, %v4029_v31  ;;  %vm4065_vm2 = vcmp.ge.f32.partialorder %v4029_v31, 0.0 }
 0x254   : > { %4386 = vst.msk [vmem:[%s7177_s18 + $0x20] sm:$0xff] %vm4381_vm5, %v4349_v49  ;;  %v4350_v16 = vadd.f32 %v7170_v48, %v4307_v37  ;;  %v4308_v41 = vadd.f32 %v4207_v14, %v4128_v13  ;;  %v4100_v49 = vmul.f32 0.01, %v4028_v39  ;;  %v4135_v13 = vsel %vm4063_vm0, %v4027_v8, %v4099_v47 }
 0x255   : > { %v4209_v38 = vpop.permute.xlu1 %4208  ;;  %vm4066_vm3 = vcmp.ge.f32.partialorder %v4030_v3, 0.0 }
 0x256   : > { %4387 = vst.msk [vmem:[%s7177_s18 + $0x28] sm:$0xff] %vm4381_vm5, %v4350_v16  ;;  %v4351_v4 = vadd.f32 %v7170_v48, %v4308_v41  ;;  %v4309_v27 = vadd.f32 %v4209_v38, %v4129_v17  ;;  %v4032_v41 = vadd.f32 %v7157_v44, %v7063_v29  ;;  %v4136_v58 = vsel %vm4064_vm1, %v4028_v39, %v4100_v49 }
 0x257   : > { %v4211_v52 = vpop.permute.xlu0 %4210  ;;  %v4102_v38 = vmul.f32 0.01, %v4030_v3 }
 0x258   : > { %4388 = vst.msk [vmem:[%s7177_s18 + $0x30] sm:$0xff] %vm4381_vm5, %v4351_v4  ;;  %v4352_v56 = vadd.f32 %v7170_v48, %v4309_v27  ;;  %v4310_v10 = vadd.f32 %v4211_v52, %v4130_v20  ;;  %v4033_v4 = vadd.f32 %v7157_v44, %v7067_v34  ;;  %v4137_v27 = vsel %vm4065_vm2, %v4029_v31, %v4101_v50 }
 0x259   : > { %v4213_v5 = vpop.permute.xlu1 %4212  ;;  %v4103_v20 = vmul.f32 0.01, %v4031_v9  ;;  %v4104_v8 = vmul.f32 0.01, %v4032_v41  ;;  %vm4068_vm6 = vcmp.ge.f32.partialorder %v4032_v41, 0.0  ;;  %v4037_v31 = vadd.f32 %v7157_v44, %v7087_v6 }
 0x25a   : > { %4389 = vst.msk [vmem:[%s7177_s18 + $0x38] sm:$0xff] %vm4381_vm5, %v4352_v56  ;;  %v4353_v1 = vadd.f32 %v7170_v48, %v4310_v10  ;;  %v4311_v26 = vadd.f32 %v4213_v5, %v4131_v43  ;;  %v4138_v56 = vsel %vm4066_vm3, %v4030_v3, %v4102_v38  ;;  %v4035_v5 = vadd.f32 %v7157_v44, %v7077_v0 }
 0x25b   : > { %v4215_v59 = vpop.permute.xlu0 %4214  ;;  %v4139_v25 = vsel %vm4067_vm4, %v4031_v9, %v4103_v20  ;;  %vm4069_vm7 = vcmp.ge.f32.partialorder %v4033_v4, 0.0  ;;  %vm4073_vm11 = vcmp.ge.f32.partialorder %v4037_v31, 0.0  ;;  %v4040_v50 = vadd.f32 %v7157_v44, %v7103_v57 }
 0x25c   : > { %4390 = vst.msk [vmem:[%s7177_s18 + $0x40] sm:$0xff] %vm4381_vm5, %v4353_v1  ;;  %v4354_v51 = vadd.f32 %v7170_v48, %v4311_v26  ;;  %v4312_v12 = vadd.f32 %v4215_v59, %v4132_v18  ;;  %v4105_v26 = vmul.f32 0.01, %v4033_v4  ;;  %v4036_v18 = vadd.f32 %v7157_v44, %v7083_v33 }
 0x25d   : > { %v4217_v40 = vpop.permute.xlu1 %4216  ;;  %v4140_v59 = vsel %vm4068_vm6, %v4032_v41, %v4104_v8  ;;  %v4107_v47 = vmul.f32 0.01, %v4035_v5  ;;  %vm4071_vm9 = vcmp.ge.f32.partialorder %v4035_v5, 0.0  ;;  %vm4076_vm14 = vcmp.ge.f32.partialorder %v4040_v50, 0.0 }
 0x25e   : > { %4391 = vst.msk [vmem:[%s7177_s18 + $0x48] sm:$0xff] %vm4381_vm5, %v4354_v51  ;;  %v4355_v63 = vadd.f32 %v7170_v48, %v4312_v12  ;;  %v4313_v61 = vadd.f32 %v4217_v40, %v4133_v32  ;;  %v4106_v51 = vmul.f32 0.01, %v4034_v15  ;;  %v4141_v32 = vsel %vm4069_vm7, %v4033_v4, %v4105_v26 }
 0x25f   : > { %v4219_v11 = vpop.permute.xlu0 %4218  ;;  %vm4072_vm10 = vcmp.ge.f32.partialorder %v4036_v18, 0.0 }
 0x260   : > { %4392 = vst.msk [vmem:[%s7177_s18 + $0x50] sm:$0xff] %vm4381_vm5, %v4355_v63  ;;  %v4356_v46 = vadd.f32 %v7170_v48, %v4313_v61  ;;  %v4314_v37 = vadd.f32 %v4219_v11, %v4134_v36  ;;  %v4038_v61 = vadd.f32 %v7157_v44, %v7093_v21  ;;  %v4142_v3 = vsel %vm4070_vm8, %v4034_v15, %v4106_v51 }
 0x261   : > { %v4221_v14 = vpop.permute.xlu1 %4220  ;;  %v4108_v11 = vmul.f32 0.01, %v4036_v18  ;;  %v4043_v15 = vadd.f32 %v7157_v44, %v7117_v45  ;;  %v4046_v51 = vadd.f32 %v7157_v44, %v7133_v7 }
 0x262   : > { %4393 = vst.msk [vmem:[%s7177_s18 + $0x58] sm:$0xff] %vm4381_vm5, %v4356_v46  ;;  %v4357_v30 = vadd.f32 %v7170_v48, %v4314_v37  ;;  %v4315_v16 = vadd.f32 %v4221_v14, %v4135_v13  ;;  %v4039_v46 = vadd.f32 %v7157_v44, %v7097_v28  ;;  %v4143_v37 = vsel %vm4071_vm9, %v4035_v5, %v4107_v47 }
 0x263   : > { %v4223_v17 = vpop.permute.xlu0 %4222  ;;  %v4109_v13 = vmul.f32 0.01, %v4037_v31  ;;  %v4110_v41 = vmul.f32 0.01, %v4038_v61  ;;  %vm4074_vm12 = vcmp.ge.f32.partialorder %v4038_v61, 0.0  ;;  %vm4079_vm1 = vcmp.ge.f32.partialorder %v4043_v15, 0.0 }
 0x264   : > { %4394 = vst.msk [vmem:[%s7177_s18 + $0x60] sm:$0xff] %vm4381_vm5, %v4357_v30  ;;  %v4358_v2 = vadd.f32 %v7170_v48, %v4315_v16  ;;  %v4316_v60 = vadd.f32 %v4223_v17, %v4136_v58  ;;  %v4144_v30 = vsel %vm4072_vm10, %v4036_v18, %v4108_v11  ;;  %v4041_v17 = vadd.f32 %v7157_v44, %v7107_v55 }
 0x265   : > { %v4225_v19 = vpop.permute.xlu1 %4224  ;;  %v4145_v38 = vsel %vm4073_vm11, %v4037_v31, %v4109_v13  ;;  %vm4075_vm13 = vcmp.ge.f32.partialorder %v4039_v46, 0.0  ;;  %vm4082_vm4 = vcmp.ge.f32.partialorder %v4046_v51, 0.0 }
 0x266   : > { %4395 = vst.msk [vmem:[%s7177_s18 + $0x68] sm:$0xff] %vm4381_vm5, %v4358_v2  ;;  %v4359_v29 = vadd.f32 %v7170_v48, %v4316_v60  ;;  %v4317_v52 = vadd.f32 %v4225_v19, %v4137_v27  ;;  %v4111_v60 = vmul.f32 0.01, %v4039_v46  ;;  %v4042_v27 = vadd.f32 %v7157_v44, %v7113_v54 }
 0x267   : > { %v4227_v10 = vpop.permute.xlu0 %4226  ;;  %v4146_v19 = vsel %vm4074_vm12, %v4038_v61, %v4110_v41  ;;  %v4113_v8 = vmul.f32 0.01, %v4041_v17  ;;  %vm4077_vm15 = vcmp.ge.f32.partialorder %v4041_v17, 0.0 }
 0x268   : > { %4396 = vst.msk [vmem:[%s7177_s18 + $0x70] sm:$0xff] %vm4381_vm5, %v4359_v29  ;;  %v4360_v34 = vadd.f32 %v7170_v48, %v4317_v52  ;;  %v4318_v43 = vadd.f32 %v4227_v10, %v4138_v56  ;;  %v4112_v29 = vmul.f32 0.01, %v4040_v50  ;;  %v4147_v56 = vsel %vm4075_vm13, %v4039_v46, %v4111_v60 }
 0x269   : > { %v4229_v1 = vpop.permute.xlu1 %4228  ;;  %vm4078_vm0 = vcmp.ge.f32.partialorder %v4042_v27, 0.0  ;;  %v4049_v46 = vadd.f32 %v7157_v44, %v7147_v53 }
 0x26a   : > { %4397 = vst.msk [vmem:[%s7177_s18 + $0x78] sm:$0xff] %vm4381_vm5, %v4360_v34  ;;  %v4361_v22 = vadd.f32 %v7170_v48, %v4318_v43  ;;  %v4319_v39 = vadd.f32 %v4229_v1, %v4139_v25  ;;  %v4044_v43 = vadd.f32 %v7157_v44, %v7123_v24  ;;  %v4148_v5 = vsel %vm4076_vm14, %v4040_v50, %v4112_v29 }
 0x26b   : > { %v4231_v23 = vpop.permute.xlu0 %4230  ;;  %v4114_v1 = vmul.f32 0.01, %v4042_v27  ;;  %vm4085_vm8 = vcmp.ge.f32.partialorder %v4049_v46, 0.0 }
 0x26c   : > { %4398 = vst.msk [vmem:[%s7177_s18 + $0x80] sm:$0xff] %vm4381_vm5, %v4361_v22  ;;  %v4362_v0 = vadd.f32 %v7170_v48, %v4319_v39  ;;  %v4320_v12 = vadd.f32 %v4231_v23, %v4140_v59  ;;  %v4045_v22 = vadd.f32 %v7157_v44, %v7127_v35  ;;  %v4149_v39 = vsel %vm4077_vm15, %v4041_v17, %v4113_v8 }
 0x26d   : > { %v4233_v40 = vpop.permute.xlu1 %4232  ;;  %v4115_v59 = vmul.f32 0.01, %v4043_v15  ;;  %v4116_v31 = vmul.f32 0.01, %v4044_v43  ;;  %vm4080_vm2 = vcmp.ge.f32.partialorder %v4044_v43, 0.0 }
 0x26e   : > { %4399 = vst.msk [vmem:[%s7177_s18 + $0x88] sm:$0xff] %vm4381_vm5, %v4362_v0  ;;  %v4363_v33 = vadd.f32 %v7170_v48, %v4320_v12  ;;  %v4321_v63 = vadd.f32 %v4233_v40, %v4141_v32  ;;  %v4150_v0 = vsel %vm4078_vm0, %v4042_v27, %v4114_v1  ;;  %v4047_v40 = vadd.f32 %v7157_v44, %v7137_v42 }
 0x26f   : > { %v4235_v36 = vpop.permute.xlu0 %4234  ;;  %v4151_v47 = vsel %vm4079_vm1, %v4043_v15, %v4115_v59  ;;  %vm4081_vm3 = vcmp.ge.f32.partialorder %v4045_v22, 0.0 }
 0x270   : > { %4400 = vst.msk [vmem:[%s7177_s18 + $0x90] sm:$0xff] %vm4381_vm5, %v4363_v33  ;;  %v4364_v6 = vadd.f32 %v7170_v48, %v4321_v63  ;;  %v4322_v49 = vadd.f32 %v4235_v36, %v4142_v3  ;;  %v4117_v63 = vmul.f32 0.01, %v4045_v22  ;;  %v4048_v3 = vadd.f32 %v7157_v44, %v7143_v62 }
 0x271   : > { %v4237_v9 = vpop.permute.xlu1 %4236  ;;  %v4152_v36 = vsel %vm4080_vm2, %v4044_v43, %v4116_v31  ;;  %v4119_v13 = vmul.f32 0.01, %v4047_v40  ;;  %vm4083_vm6 = vcmp.ge.f32.partialorder %v4047_v40, 0.0 }
 0x272   : > { %4401 = vst.msk [vmem:[%s7177_s18 + $0x98] sm:$0xff] %vm4381_vm5, %v4364_v6  ;;  %v4365_v21 = vadd.f32 %v7170_v48, %v4322_v49  ;;  %v4323_v14 = vadd.f32 %v4237_v9, %v4143_v37  ;;  %v4118_v6 = vmul.f32 0.01, %v4046_v51  ;;  %v4153_v37 = vsel %vm4081_vm3, %v4045_v22, %v4117_v63 }
 0x273   : > { %v4239_v16 = vpop.permute.xlu0 %4238  ;;  %vm4084_vm7 = vcmp.ge.f32.partialorder %v4048_v3, 0.0  ;;  %v4155_v53 = vsel %vm4083_vm6, %v4047_v40, %v4119_v13 }
 0x274   : > { %4402 = vst.msk [vmem:[%s7177_s18 + $0xa0] sm:$0xff] %vm4381_vm5, %v4365_v21  ;;  %v4366_v28 = vadd.f32 %v7170_v48, %v4323_v14  ;;  %v4324_v58 = vadd.f32 %v4239_v16, %v4144_v30  ;;  %v4154_v14 = vsel %vm4082_vm4, %v4046_v51, %v4118_v6  ;;  %v4120_v30 = vmul.f32 0.01, %v4048_v3 }
 0x275   : > { %v4241_v2 = vpop.permute.xlu1 %4240 }
 0x276   : > { %4403 = vst.msk [vmem:[%s7177_s18 + $0xa8] sm:$0xff] %vm4381_vm5, %v4366_v28  ;;  %v4367_v57 = vadd.f32 %v7170_v48, %v4324_v58  ;;  %v4325_v4 = vadd.f32 %v4241_v2, %v4145_v38  ;;  %v4121_v28 = vmul.f32 0.01, %v4049_v46  ;;  %v4156_v38 = vsel %vm4084_vm7, %v4048_v3, %v4120_v30 }
 0x277   : > { %v4243_v20 = vpop.permute.xlu0 %4242 }
 0x278   : > { %4404 = vst.msk [vmem:[%s7177_s18 + $0xb0] sm:$0xff] %vm4381_vm5, %v4367_v57  ;;  %v4368_v55 = vadd.f32 %v7170_v48, %v4325_v4  ;;  %v4326_v52 = vadd.f32 %v4243_v20, %v4146_v19  ;;  %v4157_v4 = vsel %vm4085_vm8, %v4049_v46, %v4121_v28 }
 0x279   : > { %v4245_v10 = vpop.permute.xlu1 %4244 }
 0x27a   : > { %4405 = vst.msk [vmem:[%s7177_s18 + $0xb8] sm:$0xff] %vm4381_vm5, %v4368_v55  ;;  %v4369_v54 = vadd.f32 %v7170_v48, %v4326_v52  ;;  %v4327_v34 = vadd.f32 %v4245_v10, %v4147_v56 }
 0x27b   : > { %v4247_v25 = vpop.permute.xlu0 %4246 }
 0x27c   : > { %4406 = vst.msk [vmem:[%s7177_s18 + $0xc0] sm:$0xff] %vm4381_vm5, %v4369_v54  ;;  %v4370_v45 = vadd.f32 %v7170_v48, %v4327_v34  ;;  %v4328_v26 = vadd.f32 %v4247_v25, %v4148_v5 }
 0x27d   : > { %v4249_v18 = vpop.permute.xlu1 %4248 }
 0x27e   : > { %4407 = vst.msk [vmem:[%s7177_s18 + $0xc8] sm:$0xff] %vm4381_vm5, %v4370_v45  ;;  %v4371_v24 = vadd.f32 %v7170_v48, %v4328_v26  ;;  %v4329_v23 = vadd.f32 %v4249_v18, %v4149_v39 }
 0x27f   : > { %v4251_v12 = vpop.permute.xlu0 %4250 }
 0x280   : > { %4408 = vst.msk [vmem:[%s7177_s18 + $0xd0] sm:$0xff] %vm4381_vm5, %v4371_v24  ;;  %v4372_v35 = vadd.f32 %v7170_v48, %v4329_v23  ;;  %v4330_v32 = vadd.f32 %v4251_v12, %v4150_v0 }
 0x281   : > { %v4253_v33 = vpop.permute.xlu1 %4252 }
 0x282   : > { %4409 = vst.msk [vmem:[%s7177_s18 + $0xd8] sm:$0xff] %vm4381_vm5, %v4372_v35  ;;  %v4373_v7 = vadd.f32 %v7170_v48, %v4330_v32  ;;  %v4331_v61 = vadd.f32 %v4253_v33, %v4151_v47 }
 0x283   : > { %v4255_v11 = vpop.permute.xlu0 %4254 }
 0x284   : > { %4410 = vst.msk [vmem:[%s7177_s18 + $0xe0] sm:$0xff] %vm4381_vm5, %v4373_v7  ;;  %v4374_v42 = vadd.f32 %v7170_v48, %v4331_v61  ;;  %v4332_v49 = vadd.f32 %v4255_v11, %v4152_v36 }
 0x285   : > { %v4257_v9 = vpop.permute.xlu1 %4256 }
 0x286   : > { %4411 = vst.msk [vmem:[%s7177_s18 + $0xe8] sm:$0xff] %vm4381_vm5, %v4374_v42  ;;  %v4375_v62 = vadd.f32 %v7170_v48, %v4332_v49  ;;  %v4333_v21 = vadd.f32 %v4257_v9, %v4153_v37 }
 0x287   : > { %v4259_v50 = vpop.permute.xlu0 %4258 }
 0x288   : > { %4412 = vst.msk [vmem:[%s7177_s18 + $0xf0] sm:$0xff] %vm4381_vm5, %v4375_v62  ;;  %v4376_v16 = vadd.f32 %v7170_v48, %v4333_v21  ;;  %v4334_v41 = vadd.f32 %v4259_v50, %v4154_v14 }
 0x289   : > { %v4261_v44 = vpop.permute.xlu1 %4260 }
 0x28a   : > { %4413 = vst.msk [vmem:[%s7177_s18 + $0xf8] sm:$0xff] %vm4381_vm5, %v4376_v16  ;;  %v4377_v58 = vadd.f32 %v7170_v48, %v4334_v41  ;;  %v4335_v17 = vadd.f32 %v4261_v44, %v4155_v53 }
 0x28b   : > { %v4263_v2 = vpop.permute.xlu0 %4262 }
 0x28c   : > { %4414 = vst.msk [vmem:[%s7177_s18 + $0x100] sm:$0xff] %vm4381_vm5, %v4377_v58  ;;  %v4378_v60 = vadd.f32 %v7170_v48, %v4335_v17  ;;  %v4336_v57 = vadd.f32 %v4263_v2, %v4156_v38 }
 0x28d   : > { %v4265_v27 = vpop.permute.xlu1 %4264 }
 0x28e   : > { %4415 = vst.msk [vmem:[%s7177_s18 + $0x108] sm:$0xff] %vm4381_vm5, %v4378_v60  ;;  %v4379_v19 = vadd.f32 %v7170_v48, %v4336_v57  ;;  %v4337_v20 = vadd.f32 %v4265_v27, %v4157_v4 }
 0x290   : > { %4416 = vst.msk [vmem:[%s7177_s18 + $0x110] sm:$0xff] %vm4381_vm5, %v4379_v19  ;;  %v4380_v29 = vadd.f32 %v7170_v48, %v4337_v20 }
 0x292   : > { %4417 = vst.msk [vmem:[%s7177_s18 + $0x118] sm:$0xff] %vm4381_vm5, %v4380_v29 }
 0x293 PF: > { %s14_s15 = sadd.s32 1, %s5718_s15  }
 0x294   : > { %p11_p5 = scmp.ge.s32.totalorder %s14_s15, 4  }
 0x296   :  { %13 = sbr.rel (!%p11_p5) target bundleno = 1 (0x1), region = 74 }

</bundles_post_ra>
